<compile_context>
chip_gen: v5e
topology: v5e:2x2
jax: 0.10.0
libtpu: 0.0.40
codegen_flags: <defaults>
</compile_context>

<pallas_src>
import functools
import math
from typing import Any, Dict, List

import numpy as np
import jax
import jax.numpy as jnp
from jax.experimental import pallas as pl
from jax.experimental.pallas import tpu as pltpu

# ----------------------------- configuration --------------------------------
IMG_SIZE = 32          # image_encoder.img_size
PATCH = 8              # patch size
GRID = IMG_SIZE // PATCH
EMBED = 32             # ViT width
PROMPT_DIM = 32        # prompt / decoder channel dim
NUM_HEADS = 2
MLP_RATIO = 2
NUM_MASK_TOKENS = 4    # 3 + 1 (as in SAM)


# ----------------------------- in-kernel helpers ------------------------------
def _gelu(x):
    # TODO(synk): PyTorch nn.GELU defaults to erf; tanh approx used (EUP friendly).
    return 0.5 * x * (1.0 + jnp.tanh(0.7978845608028654 * (x + 0.044715 * x * x * x)))


def _ln(x, g, b, eps=1e-6):
    mu = jnp.mean(x, axis=-1, keepdims=True)
    var = jnp.mean(jnp.square(x - mu), axis=-1, keepdims=True)
    return (x - mu) * jax.lax.rsqrt(var + eps) * g + b


def _sdpa(q, k, v):
    """softmax(q k^T / sqrt(d)) v on 2-D (seq, head_dim) tiles."""
    scale = 1.0 / math.sqrt(q.shape[-1])
    s = jax.lax.dot_general(q, k, (((1,), (1,)), ((), ())),
                            preferred_element_type=jnp.float32) * scale
    s = s - jnp.max(s, axis=-1, keepdims=True)
    e = jnp.exp(s)
    p = e / jnp.sum(e, axis=-1, keepdims=True)
    return jnp.dot(p, v, preferred_element_type=jnp.float32)


def _vmem_specs(n):
    return [pl.BlockSpec(memory_space=pltpu.MemorySpace.VMEM) for _ in range(n)]


# ----------------------------- fused encoder kernel ---------------------------
_ENC_PARAM_ORDER = ("patch_w", "patch_b", "ln1_g", "ln1_b", "qkv_w", "qkv_b",
                    "proj_w", "proj_b", "ln2_g", "ln2_b", "mlp1_w", "mlp1_b",
                    "mlp2_w", "mlp2_b", "neck_w", "neck_b", "neck_ln_g", "neck_ln_b")


def _encoder_kernel(patches_ref, pos_ref,
                    pw_ref, pb_ref, ln1g_ref, ln1b_ref, qkvw_ref, qkvb_ref,
                    projw_ref, projb_ref, ln2g_ref, ln2b_ref,
                    m1w_ref, m1b_ref, m2w_ref, m2b_ref,
                    nw_ref, nb_ref, nlg_ref, nlb_ref,
                    out_ref):
    T = GRID * GRID
    E = EMBED
    hd = E // NUM_HEADS
    batch = patches_ref.shape[0] // T

    # patch embed (pixel normalization already folded into pw/pb) + pos embed
    tok = jnp.dot(patches_ref[...], pw_ref[...],
                  preferred_element_type=jnp.float32) + pb_ref[...]
    tok = tok + pos_ref[...]

    # transformer block: LN -> MHA -> proj -> residual
    x = _ln(tok, ln1g_ref[...], ln1b_ref[...])
    qkv = jnp.dot(x, qkvw_ref[...], preferred_element_type=jnp.float32) + qkvb_ref[...]
    rows = []
    for b in range(batch):
        r0 = b * T
        heads = []
        for h in range(NUM_HEADS):
            c0 = h * hd
            qh = qkv[r0:r0 + T, c0:c0 + hd]
            kh = qkv[r0:r0 + T, E + c0:E + c0 + hd]
            vh = qkv[r0:r0 + T, 2 * E + c0:2 * E + c0 + hd]
            heads.append(_sdpa(qh, kh, vh))
        rows.append(jnp.concatenate(heads, axis=1))
    att = jnp.concatenate(rows, axis=0)
    tok = tok + (jnp.dot(att, projw_ref[...], preferred_element_type=jnp.float32)
                 + projb_ref[...])

    # LN -> MLP(gelu) -> residual
    x = _ln(tok, ln2g_ref[...], ln2b_ref[...])
    h1 = _gelu(jnp.dot(x, m1w_ref[...], preferred_element_type=jnp.float32) + m1b_ref[...])
    tok = tok + (jnp.dot(h1, m2w_ref[...], preferred_element_type=jnp.float32) + m2b_ref[...])

    # neck: 1x1 conv (matmul) to PROMPT_DIM + channel layernorm
    # TODO(synk): SAM's neck also has a 3x3 conv + second LayerNorm2d; omitted here.
    neck = jnp.dot(tok, nw_ref[...], preferred_element_type=jnp.float32) + nb_ref[...]
    out_ref[...] = _ln(neck, nlg_ref[...], nlb_ref[...])


@jax.jit
def _encode_fn(pk, images):
    """images: (B, 3, IMG, IMG) raw, pad region pre-filled with pixel_mean."""
    B = images.shape[0]
    T = GRID * GRID
    patches = images.reshape(B, 3, GRID, PATCH, GRID, PATCH)
    patches = patches.transpose(0, 2, 4, 1, 3, 5).reshape(B * T, 3 * PATCH * PATCH)
    pos = jnp.tile(pk["pos_embed"], (B, 1))
    args = (patches, pos) + tuple(pk[k] for k in _ENC_PARAM_ORDER)
    return pl.pallas_call(
        _encoder_kernel,
        out_shape=jax.ShapeDtypeStruct((B * T, PROMPT_DIM), jnp.float32),
        in_specs=_vmem_specs(len(args)),
        out_specs=pl.BlockSpec(memory_space=pltpu.MemorySpace.VMEM),
    )(*args)


# ----------------------------- fused decoder kernel ---------------------------
_DEC_PARAM_ORDER = ("attn_w", "attn_b", "ln_g", "ln_b",
                    "tmlp1_w", "tmlp1_b", "tmlp2_w", "tmlp2_b",
                    "up1_w", "up1_b", "up_ln_g", "up_ln_b", "up2_w", "up2_b",
                    "hyper_w1", "hyper_b1", "hyper_w2", "hyper_b2",
                    "iou_w1", "iou_b1", "iou_w2", "iou_b2")


def _decoder_kernel(tokens_ref, src_ref, pos_ref,
                    aw_ref, ab_ref, lng_ref, lnb_ref,
                    t1w_ref, t1b_ref, t2w_ref, t2b_ref,
                    u1w_ref, u1b_ref, ulg_ref, ulb_ref, u2w_ref, u2b_ref,
                    hw1_ref, hb1_ref, hw2_ref, hb2_ref,
                    iw1_ref, ib1_ref, iw2_ref, ib2_ref,
                    masks_ref, iou_ref):
    C = PROMPT_DIM
    hd = C // NUM_HEADS
    hw = GRID * GRID

    lng = lng_ref[...]            # (5, C)
    lnb = lnb_ref[...]

    def attn(m, q_x, k_x, v_x):
        base = m * 4 * C

        def proj(x, j):
            w = aw_ref[base + j * C: base + (j + 1) * C, :]
            b = ab_ref[m * 4 + j: m * 4 + j + 1, :]
            return jnp.dot(x, w, preferred_element_type=jnp.float32) + b

        q = proj(q_x, 0)
        k = proj(k_x, 1)
        v = proj(v_x, 2)
        heads = []
        for h in range(NUM_HEADS):
            c0 = h * hd
            heads.append(_sdpa(q[:, c0:c0 + hd], k[:, c0:c0 + hd], v[:, c0:c0 + hd]))
        o = jnp.concatenate(heads, axis=1)
        return (jnp.dot(o, aw_ref[base + 3 * C: base + 4 * C, :],
                        preferred_element_type=jnp.float32)
                + ab_ref[m * 4 + 3: m * 4 + 4, :])

    q = tokens_ref[...]
    k = src_ref[...]
    pos = pos_ref[...]

    # two-way attention block (simplified)
    # TODO(synk): real SAM TwoWayTransformer has depth=2 and adds the prompt PE to queries.
    q = _ln(q + attn(0, q, q, q), lng[0:1], lnb[0:1])
    q = _ln(q + attn(1, q, k + pos, k), lng[1:2], lnb[1:2])
    mlp_out = jnp.maximum(
        jnp.dot(q, t1w_ref[...], preferred_element_type=jnp.float32) + t1b_ref[...], 0.0)
    mlp_out = jnp.dot(mlp_out, t2w_ref[...], preferred_element_type=jnp.float32) + t2b_ref[...]
    q = _ln(q + mlp_out, lng[2:3], lnb[2:3])
    k = _ln(k + attn(2, k + pos, q, q), lng[3:4], lnb[3:4])
    q = _ln(q + attn(3, q, k + pos, k), lng[4:5], lnb[4:5])

    # hypernetwork MLPs for the mask tokens (batched into this kernel)
    # TODO(synk): depth reduced from 3 to 2 layers vs. real SAM.
    hyper = []
    for i in range(NUM_MASK_TOKENS):
        t = q[1 + i: 2 + i, :]
        h1 = jnp.maximum(
            jnp.dot(t, hw1_ref[i * C:(i + 1) * C, :], preferred_element_type=jnp.float32)
            + hb1_ref[i:i + 1, :], 0.0)
        hyper.append(
            jnp.dot(h1, hw2_ref[i * C:(i + 1) * C, :], preferred_element_type=jnp.float32)
            + hb2_ref[i:i + 1, :])
    hyper_in = jnp.concatenate(hyper, axis=0)          # (4, C//8)

    # output upscaling (two stride-2 transposed convs) computed in a blocked
    # layout (columns grouped per (di,dj)/(ei,ej) offsets) so only 2-D slices,
    # matmuls and elementwise ops are needed; the raster reorder is done by a
    # tiny XLA transpose on the (4, 256) result outside the kernel.
    up1 = jnp.dot(k, u1w_ref[...], preferred_element_type=jnp.float32) + u1b_ref[...]
    C4 = C // 4
    C8 = C // 8
    cols = []
    for j in range(4):                                  # j = 2*di + dj
        blk = _gelu(_ln(up1[:, j * C4:(j + 1) * C4], ulg_ref[...], ulb_ref[...]))
        u2 = _gelu(jnp.dot(blk, u2w_ref[...], preferred_element_type=jnp.float32)
                   + u2b_ref[...])
        for e in range(4):                              # e = 2*ei + ej
            sub = u2[:, e * C8:(e + 1) * C8]            # (hw, C8)
            cols.append(jax.lax.dot_general(
                hyper_in, sub, (((1,), (1,)), ((), ())),
                preferred_element_type=jnp.float32))    # (4, hw)
    masks_ref[...] = jnp.concatenate(cols, axis=1)      # (4, 16*hw) lane-dense

    iou_h = jnp.maximum(
        jnp.dot(q[0:1], iw1_ref[...], preferred_element_type=jnp.float32) + ib1_ref[...], 0.0)
    iou_ref[...] = jnp.dot(iou_h, iw2_ref[...], preferred_element_type=jnp.float32) + ib2_ref[...]


# ----------------------------- fused bilinear resize --------------------------
def _resize_kernel(x_ref, rh_ref, rw_ref, o_ref):
    """out[n] = Rh @ x[n] @ Rw^T for every plane n (separable bilinear, fused)."""
    rh = rh_ref[...]
    rw = rw_ref[...]
    for n in range(x_ref.shape[0]):
        t = jnp.dot(rh, x_ref[n], preferred_element_type=jnp.float32)
        o_ref[n] = jax.lax.dot_general(t, rw, (((1,), (1,)), ((), ())),
                                       preferred_element_type=jnp.float32)


def _resize_call(x, rh, rw):
    P = x.shape[0]
    oh, ow = rh.shape[0], rw.shape[0]
    return pl.pallas_call(
        _resize_kernel,
        out_shape=jax.ShapeDtypeStruct((P, oh, ow), jnp.float32),
        in_specs=_vmem_specs(3),
        out_specs=pl.BlockSpec(memory_space=pltpu.MemorySpace.VMEM),
    )(x, rh, rw)


def _bilinear_matrix_np(out_size, in_size):
    """Interpolation matrix matching F.interpolate(mode='bilinear', align_corners=False)."""
    m = np.zeros((out_size, in_size), np.float32)
    if in_size == 1:
        m[:, 0] = 1.0
        return m
    scale = in_size / out_size
    for i in range(out_size):
        src = max((i + 0.5) * scale - 0.5, 0.0)
        i0 = min(int(np.floor(src)), in_size - 1)
        i1 = min(i0 + 1, in_size - 1)
        w = src - i0
        m[i, i0] += 1.0 - w
        m[i, i1] += w
    return m


def _postprocess_matrices(low_hw, pad_to, crop_hw, out_hw):
    """Compose resize(pad_to) -> crop(crop_hw) -> resize(out_hw) into one matrix pair."""
    rh = _bilinear_matrix_np(out_hw[0], crop_hw[0]) @ \
        _bilinear_matrix_np(pad_to, low_hw[0])[:crop_hw[0], :]
    rw = _bilinear_matrix_np(out_hw[1], crop_hw[1]) @ \
        _bilinear_matrix_np(pad_to, low_hw[1])[:crop_hw[1], :]
    return jnp.asarray(rh), jnp.asarray(rw)


# ----------------------------- fused decode step ------------------------------
@jax.jit
def _decode_fn(pk, curr, coords, labels, rh, rw, threshold):
    C = PROMPT_DIM

    # sparse prompt embedding: random-Fourier PE done as elementwise math (no kernel)
    cn = 2.0 * ((coords + 0.5) / IMG_SIZE) - 1.0
    g = pk["pe_gauss"]                                   # (2, C//2)
    proj = cn[:, 0:1] * g[0][None, :] + cn[:, 1:2] * g[1][None, :]
    proj = 2.0 * np.pi * proj
    pe = jnp.concatenate([jnp.sin(proj), jnp.cos(proj)], axis=-1)
    lab = labels[:, None]
    sparse = jnp.where(lab == -1, pk["not_a_point"], pe)
    sparse = sparse + jnp.where(lab == 0, pk["point_embed"][0:1], 0.0)
    sparse = sparse + jnp.where(lab == 1, pk["point_embed"][1:2], 0.0)

    tokens = jnp.concatenate([pk["iou_token"], pk["mask_tokens"], sparse], axis=0)
    src = curr + pk["no_mask_embed"]                     # dense (no-mask) embedding

    args = (tokens, src, pk["dense_pe"]) + tuple(pk[k] for k in _DEC_PARAM_ORDER)
    masks_blk, iou = pl.pallas_call(
        _decoder_kernel,
        out_shape=(jax.ShapeDtypeStruct((NUM_MASK_TOKENS, 16 * GRID * GRID), jnp.float32),
                   jax.ShapeDtypeStruct((1, NUM_MASK_TOKENS), jnp.float32)),
        in_specs=_vmem_specs(len(args)),
        out_specs=(pl.BlockSpec(memory_space=pltpu.MemorySpace.VMEM),
                   pl.BlockSpec(memory_space=pltpu.MemorySpace.VMEM)),
    )(*args)

    # blocked (di,dj,ei,ej,gi,gj) column order -> raster (16,16); tiny XLA transpose.
    mb = masks_blk.reshape(NUM_MASK_TOKENS, 2, 2, 2, 2, GRID, GRID)
    low = mb.transpose(0, 5, 1, 3, 6, 2, 4).reshape(NUM_MASK_TOKENS, 4 * GRID, 4 * GRID)
    low_res = low[None]                                  # (1, 4, 16, 16)

    up = _resize_call(low, rh, rw)                       # (4, OH, OW)
    masks = (up > threshold)[None]                       # (1, 4, OH, OW) bool
    return masks, iou, low_res


# ----------------------------- parameters -------------------------------------
def init_params(key):
    keys = iter(jax.random.split(key, 128))

    def nrm(shape, scale=0.02):
        return scale * jax.random.normal(next(keys), shape, dtype=jnp.float32)

    def zeros(n):
        return jnp.zeros((n,), jnp.float32)

    def ones(n):
        return jnp.ones((n,), jnp.float32)

    C, E = PROMPT_DIM, EMBED
    p = {
        # --- image encoder (tiny ViT) ---
        "patch_w": nrm((3 * PATCH * PATCH, E)), "patch_b": zeros(E),
        "pos_embed": nrm((GRID * GRID, E)),
        "ln1_g": ones(E), "ln1_b": zeros(E),
        "qkv_w": nrm((E, 3 * E)), "qkv_b": zeros(3 * E),
        "proj_w": nrm((E, E)), "proj_b": zeros(E),
        "ln2_g": ones(E), "ln2_b": zeros(E),
        "mlp1_w": nrm((E, MLP_RATIO * E)), "mlp1_b": zeros(MLP_RATIO * E),
        "mlp2_w": nrm((MLP_RATIO * E, E)), "mlp2_b": zeros(E),
        "neck_w": nrm((E, C)), "neck_b": zeros(C),
        "neck_ln_g": ones(C), "neck_ln_b": zeros(C),
        # --- prompt encoder ---
        "pe_gauss": jax.random.normal(next(keys), (2, C // 2), dtype=jnp.float32),
        "point_embed": nrm((2, C)),
        "not_a_point": nrm((1, C)),
        "no_mask_embed": nrm((1, C)),
        # --- mask decoder ---
        "iou_token": nrm((1, C)),
        "mask_tokens": nrm((NUM_MASK_TOKENS, C)),
        "tmlp1_w": nrm((C, MLP_RATIO * C)), "tmlp1_b": zeros(MLP_RATIO * C),
        "tmlp2_w": nrm((MLP_RATIO * C, C)), "tmlp2_b": zeros(C),
        "up1_w": nrm((C, (C // 4) * 4)), "up1_b": zeros((C // 4) * 4),
        "up_ln_g": ones(C // 4), "up_ln_b": zeros(C // 4),
        "up2_w": nrm((C // 4, (C // 8) * 4)), "up2_b": zeros((C // 8) * 4),
        "iou_w1": nrm((C, C)), "iou_b1": zeros(C),
        "iou_w2": nrm((C, NUM_MASK_TOKENS)), "iou_b2": zeros(NUM_MASK_TOKENS),
    }
    for name in ("ln_t1", "ln_t2", "ln_t3", "ln_t4", "ln_tf"):
        p[name + "_g"] = ones(C)
        p[name + "_b"] = zeros(C)
    for name in ("self_attn", "cross_t2i", "cross_i2t", "final_attn"):
        p[name] = {
            "q_w": nrm((C, C)), "q_b": zeros(C),
            "k_w": nrm((C, C)), "k_b": zeros(C),
            "v_w": nrm((C, C)), "v_b": zeros(C),
            "o_w": nrm((C, C)), "o_b": zeros(C),
        }
    p["hyper_w1"] = [nrm((C, C)) for _ in range(NUM_MASK_TOKENS)]
    p["hyper_b1"] = [zeros(C) for _ in range(NUM_MASK_TOKENS)]
    p["hyper_w2"] = [nrm((C, C // 8)) for _ in range(NUM_MASK_TOKENS)]
    p["hyper_b2"] = [zeros(C // 8) for _ in range(NUM_MASK_TOKENS)]
    return p


def _pack_encoder_params(p, pixel_mean, pixel_std):
    """Pack encoder params for the fused kernel; fold (x-mean)/std into patch-embed."""
    ppp = PATCH * PATCH
    E = EMBED
    istd = jnp.repeat(1.0 / pixel_std, ppp)                       # (3*P*P,)
    mshift = jnp.repeat(pixel_mean / pixel_std, ppp)              # mean/std per column
    w_eff = p["patch_w"] * istd[:, None]
    b_eff = p["patch_b"] - mshift @ p["patch_w"]
    r2 = lambda a: a.reshape(1, -1)
    return {
        "pos_embed": p["pos_embed"],
        "patch_w": w_eff, "patch_b": r2(b_eff),
        "ln1_g": r2(p["ln1_g"]), "ln1_b": r2(p["ln1_b"]),
        "qkv_w": p["qkv_w"], "qkv_b": r2(p["qkv_b"]),
        "proj_w": p["proj_w"], "proj_b": r2(p["proj_b"]),
        "ln2_g": r2(p["ln2_g"]), "ln2_b": r2(p["ln2_b"]),
        "mlp1_w": p["mlp1_w"], "mlp1_b": r2(p["mlp1_b"]),
        "mlp2_w": p["mlp2_w"], "mlp2_b": r2(p["mlp2_b"]),
        "neck_w": p["neck_w"], "neck_b": r2(p["neck_b"]),
        "neck_ln_g": r2(p["neck_ln_g"]), "neck_ln_b": r2(p["neck_ln_b"]),
    }


def _pack_decoder_params(p):
    """Pack/stack decoder params into a few 2-D arrays for the fused kernel."""
    C = PROMPT_DIM
    mods = ("self_attn", "cross_t2i", "cross_i2t", "final_attn")
    attn_w = jnp.concatenate([p[m][n] for m in mods for n in ("q_w", "k_w", "v_w", "o_w")],
                             axis=0)                                   # (16C, C)
    attn_b = jnp.stack([p[m][n] for m in mods for n in ("q_b", "k_b", "v_b", "o_b")],
                       axis=0)                                         # (16, C)
    ln_g = jnp.stack([p[n + "_g"] for n in ("ln_t1", "ln_t2", "ln_t3", "ln_t4", "ln_tf")])
    ln_b = jnp.stack([p[n + "_b"] for n in ("ln_t1", "ln_t2", "ln_t3", "ln_t4", "ln_tf")])
    r2 = lambda a: a.reshape(1, -1)

    # dense positional encoding (get_dense_pe), computed once here.
    g = GRID
    ys = (jnp.arange(g, dtype=jnp.float32) + 0.5) / g
    xs = (jnp.arange(g, dtype=jnp.float32) + 0.5) / g
    gy, gx = jnp.meshgrid(ys, xs, indexing="ij")
    coords = jnp.stack([gx, gy], axis=-1).reshape(-1, 2)
    proj = 2.0 * np.pi * ((2.0 * coords - 1.0) @ p["pe_gauss"])
    dense_pe = jnp.concatenate([jnp.sin(proj), jnp.cos(proj)], axis=-1)   # (HW, C)

    return {
        "pe_gauss": p["pe_gauss"], "point_embed": p["point_embed"],
        "not_a_point": p["not_a_point"], "no_mask_embed": p["no_mask_embed"],
        "iou_token": p["iou_token"], "mask_tokens": p["mask_tokens"],
        "dense_pe": dense_pe,
        "attn_w": attn_w, "attn_b": attn_b, "ln_g": ln_g, "ln_b": ln_b,
        "tmlp1_w": p["tmlp1_w"], "tmlp1_b": r2(p["tmlp1_b"]),
        "tmlp2_w": p["tmlp2_w"], "tmlp2_b": r2(p["tmlp2_b"]),
        "up1_w": p["up1_w"], "up1_b": r2(p["up1_b"]),
        "up_ln_g": r2(p["up_ln_g"]), "up_ln_b": r2(p["up_ln_b"]),
        "up2_w": p["up2_w"], "up2_b": r2(p["up2_b"]),
        "hyper_w1": jnp.concatenate(p["hyper_w1"], axis=0),            # (4C, C)
        "hyper_b1": jnp.stack(p["hyper_b1"], axis=0),                  # (4, C)
        "hyper_w2": jnp.concatenate(p["hyper_w2"], axis=0),            # (4C, C//8)
        "hyper_b2": jnp.stack(p["hyper_b2"], axis=0),                  # (4, C//8)
        "iou_w1": p["iou_w1"], "iou_b1": r2(p["iou_b1"]),
        "iou_w2": p["iou_w2"], "iou_b2": r2(p["iou_b2"]),
    }


# ----------------------------- Sam module --------------------------------------
class Sam:
    mask_threshold: float = 0.0
    image_format: str = "RGB"

    def __init__(self, params,
                 pixel_mean=(123.675, 116.28, 103.53),
                 pixel_std=(58.395, 57.12, 57.375)):
        self.params = params
        self.pixel_mean = jnp.asarray(pixel_mean, jnp.float32)
        self.pixel_std = jnp.asarray(pixel_std, jnp.float32)
        self.img_size = IMG_SIZE
        # pre-packed kernel parameter sets (computed once)
        self.enc_packed = _pack_encoder_params(params, self.pixel_mean, self.pixel_std)
        self.dec_packed = _pack_decoder_params(params)

    def preprocess(self, x):
        """Pad to img_size; pad region is filled with pixel_mean so that the
        normalization folded into the patch-embed weights maps it to exactly 0
        (equivalent to normalize-then-zero-pad of the reference)."""
        x = x.astype(jnp.float32)
        h, w = x.shape[-2:]
        x = jnp.pad(x, ((0, 0), (0, self.img_size - h), (0, self.img_size - w)))
        valid = ((jnp.arange(self.img_size) < h)[:, None]
                 & (jnp.arange(self.img_size) < w)[None, :])
        return jnp.where(valid[None, :, :], x, self.pixel_mean[:, None, None])

    def forward(self, batched_input: List[Dict[str, Any]]) -> List[Dict[str, Any]]:
        input_images = jnp.stack([self.preprocess(r["image"]) for r in batched_input], axis=0)
        embeddings = _encode_fn(self.enc_packed, input_images)     # (B*HW, C)
        hw = GRID * GRID
        low_hw = (4 * GRID, 4 * GRID)

        outputs = []
        for i, rec in enumerate(batched_input):
            if "point_coords" in rec:
                coords = jnp.concatenate([rec["point_coords"].astype(jnp.float32),
                                          jnp.zeros((1, 2), jnp.float32)], axis=0)
                labels = jnp.concatenate([rec["point_labels"].astype(jnp.int32),
                                          -jnp.ones((1,), jnp.int32)], axis=0)
            else:
                # TODO(synk): real SAM returns an empty (1,0,C) sparse tensor; one pad point used.
                coords = jnp.zeros((1, 2), jnp.float32)
                labels = -jnp.ones((1,), jnp.int32)

            curr = embeddings[i * hw:(i + 1) * hw]
            rh, rw = _postprocess_matrices(low_hw, self.img_size,
                                           tuple(rec["image"].shape[-2:]),
                                           tuple(rec["original_size"]))
            masks, iou, low_res = _decode_fn(self.dec_packed, curr, coords, labels,
                                             rh, rw, float(self.mask_threshold))
            outputs.append({"masks": masks,
                            "iou_predictions": iou,
                            "low_res_logits": low_res})
        return outputs


# ----------------------------- main ---------------------------------------------
if __name__ == "__main__":
    key = jax.random.PRNGKey(0)
    kp, k1, k2 = jax.random.split(key, 3)
    params = init_params(kp)
    sam = Sam(params)

    img0 = jax.random.uniform(k1, (3, 24, 28), minval=0.0, maxval=255.0)
    img1 = jax.random.uniform(k2, (3, 24, 28), minval=0.0, maxval=255.0)
    batched_input = [
        {"image": img0,
         "point_coords": jnp.array([[10.0, 12.0], [20.0, 5.0]], jnp.float32),
         "point_labels": jnp.array([1, 0], jnp.int32),
         "original_size": (20, 26)},
        {"image": img1,
         "point_coords": jnp.array([[8.0, 8.0]], jnp.float32),
         "point_labels": jnp.array([1], jnp.int32),
         "original_size": (20, 26)},
    ]

    outputs = sam.forward(batched_input)
    jax.block_until_ready([(o["masks"], o["iou_predictions"], o["low_res_logits"])
                           for o in outputs])
    assert outputs[0]["masks"].shape == (1, NUM_MASK_TOKENS, 20, 26)
    assert outputs[0]["iou_predictions"].shape == (1, NUM_MASK_TOKENS)
    assert outputs[0]["low_res_logits"].shape == (1, NUM_MASK_TOKENS, 16, 16)
    assert outputs[1]["masks"].shape == (1, NUM_MASK_TOKENS, 20, 26)
    print("KERNEL_OK")
</pallas_src>

<mosaic_0001>
module attributes {stable_mosaic.version = 11 : i64} {
  func.func @_encoder_kernel(%arg0: memref<32x192xf32, #tpu.memory_space<vmem>>, %arg1: memref<32x32xf32, #tpu.memory_space<vmem>>, %arg2: memref<192x32xf32, #tpu.memory_space<vmem>>, %arg3: memref<1x32xf32, #tpu.memory_space<vmem>>, %arg4: memref<1x32xf32, #tpu.memory_space<vmem>>, %arg5: memref<1x32xf32, #tpu.memory_space<vmem>>, %arg6: memref<32x96xf32, #tpu.memory_space<vmem>>, %arg7: memref<1x96xf32, #tpu.memory_space<vmem>>, %arg8: memref<32x32xf32, #tpu.memory_space<vmem>>, %arg9: memref<1x32xf32, #tpu.memory_space<vmem>>, %arg10: memref<1x32xf32, #tpu.memory_space<vmem>>, %arg11: memref<1x32xf32, #tpu.memory_space<vmem>>, %arg12: memref<32x64xf32, #tpu.memory_space<vmem>>, %arg13: memref<1x64xf32, #tpu.memory_space<vmem>>, %arg14: memref<64x32xf32, #tpu.memory_space<vmem>>, %arg15: memref<1x32xf32, #tpu.memory_space<vmem>>, %arg16: memref<32x32xf32, #tpu.memory_space<vmem>>, %arg17: memref<1x32xf32, #tpu.memory_space<vmem>>, %arg18: memref<1x32xf32, #tpu.memory_space<vmem>>, %arg19: memref<1x32xf32, #tpu.memory_space<vmem>>, %arg20: memref<32x32xf32, #tpu.memory_space<vmem>>) attributes {dimension_semantics = [], scalar_prefetch = 0 : i64, scratch_operands = 0 : i64, tpu.core_type = #tpu.core_type<tc>} {
    %c0 = arith.constant 0 : index
    %c0_0 = arith.constant 0 : index
    %0 = vector.load %arg0[%c0, %c0_0] : memref<32x192xf32, #tpu.memory_space<vmem>>, vector<32x192xf32>
    %c0_1 = arith.constant 0 : index
    %c0_2 = arith.constant 0 : index
    %1 = vector.load %arg2[%c0_1, %c0_2] : memref<192x32xf32, #tpu.memory_space<vmem>>, vector<192x32xf32>
    %cst = arith.constant dense<0.000000e+00> : vector<32x32xf32>
    %2 = tpu.matmul %0, %1, %cst {dimension_numbers = #tpu.dot_dimension_numbers<[1], [0], [0], [1], [0, 0, 1, 1], [], []>} : vector<32x192xf32>, vector<192x32xf32>, vector<32x32xf32> -> vector<32x32xf32>
    %c0_3 = arith.constant 0 : index
    %c0_4 = arith.constant 0 : index
    %3 = vector.load %arg3[%c0_3, %c0_4] : memref<1x32xf32, #tpu.memory_space<vmem>>, vector<1x32xf32>
    %4 = vector.broadcast %3 : vector<1x32xf32> to vector<32x32xf32>
    %5 = arith.addf %2, %4 : vector<32x32xf32>
    %c0_5 = arith.constant 0 : index
    %c0_6 = arith.constant 0 : index
    %6 = vector.load %arg1[%c0_5, %c0_6] : memref<32x32xf32, #tpu.memory_space<vmem>>, vector<32x32xf32>
    %7 = arith.addf %5, %6 : vector<32x32xf32>
    %c0_7 = arith.constant 0 : index
    %c0_8 = arith.constant 0 : index
    %8 = vector.load %arg4[%c0_7, %c0_8] : memref<1x32xf32, #tpu.memory_space<vmem>>, vector<1x32xf32>
    %c0_9 = arith.constant 0 : index
    %c0_10 = arith.constant 0 : index
    %9 = vector.load %arg5[%c0_9, %c0_10] : memref<1x32xf32, #tpu.memory_space<vmem>>, vector<1x32xf32>
    %cst_11 = arith.constant dense<0.000000e+00> : vector<32xf32>
    %10 = vector.multi_reduction <add>, %7, %cst_11 [1] : vector<32x32xf32> to vector<32xf32>
    %11 = vector.shape_cast %10 : vector<32xf32> to vector<32x1xf32>
    %cst_12 = arith.constant 3.200000e+01 : f32
    %12 = vector.broadcast %cst_12 : f32 to vector<32x1xf32>
    %13 = arith.divf %11, %12 : vector<32x1xf32>
    %14 = vector.broadcast %13 : vector<32x1xf32> to vector<32x32xf32>
    %15 = arith.subf %7, %14 : vector<32x32xf32>
    %16 = arith.mulf %15, %15 : vector<32x32xf32>
    %cst_13 = arith.constant dense<0.000000e+00> : vector<32xf32>
    %17 = vector.multi_reduction <add>, %16, %cst_13 [1] : vector<32x32xf32> to vector<32xf32>
    %18 = vector.shape_cast %17 : vector<32xf32> to vector<32x1xf32>
    %cst_14 = arith.constant 3.200000e+01 : f32
    %19 = vector.broadcast %cst_14 : f32 to vector<32x1xf32>
    %20 = arith.divf %18, %19 : vector<32x1xf32>
    %21 = vector.broadcast %13 : vector<32x1xf32> to vector<32x32xf32>
    %22 = arith.subf %7, %21 : vector<32x32xf32>
    %cst_15 = arith.constant 9.99999997E-7 : f32
    %23 = vector.broadcast %cst_15 : f32 to vector<32x1xf32>
    %24 = arith.addf %20, %23 : vector<32x1xf32>
    %25 = math.rsqrt %24 : vector<32x1xf32>
    %26 = vector.broadcast %25 : vector<32x1xf32> to vector<32x32xf32>
    %27 = arith.mulf %22, %26 : vector<32x32xf32>
    %28 = vector.broadcast %8 : vector<1x32xf32> to vector<32x32xf32>
    %29 = arith.mulf %27, %28 : vector<32x32xf32>
    %30 = vector.broadcast %9 : vector<1x32xf32> to vector<32x32xf32>
    %31 = arith.addf %29, %30 : vector<32x32xf32>
    %c0_16 = arith.constant 0 : index
    %c0_17 = arith.constant 0 : index
    %32 = vector.load %arg6[%c0_16, %c0_17] : memref<32x96xf32, #tpu.memory_space<vmem>>, vector<32x96xf32>
    %cst_18 = arith.constant dense<0.000000e+00> : vector<32x96xf32>
    %33 = tpu.matmul %31, %32, %cst_18 {dimension_numbers = #tpu.dot_dimension_numbers<[1], [0], [0], [1], [0, 0, 1, 1], [], []>} : vector<32x32xf32>, vector<32x96xf32>, vector<32x96xf32> -> vector<32x96xf32>
    %c0_19 = arith.constant 0 : index
    %c0_20 = arith.constant 0 : index
    %34 = vector.load %arg7[%c0_19, %c0_20] : memref<1x96xf32, #tpu.memory_space<vmem>>, vector<1x96xf32>
    %35 = vector.broadcast %34 : vector<1x96xf32> to vector<32x96xf32>
    %36 = arith.addf %33, %35 : vector<32x96xf32>
    %37 = vector.extract_strided_slice %36 {offsets = [0, 0], sizes = [16, 16], strides = [1, 1]} : vector<32x96xf32> to vector<16x16xf32>
    %38 = vector.extract_strided_slice %36 {offsets = [0, 32], sizes = [16, 16], strides = [1, 1]} : vector<32x96xf32> to vector<16x16xf32>
    %39 = vector.extract_strided_slice %36 {offsets = [0, 64], sizes = [16, 16], strides = [1, 1]} : vector<32x96xf32> to vector<16x16xf32>
    %cst_21 = arith.constant dense<0.000000e+00> : vector<16x16xf32>
    %40 = tpu.matmul %37, %38, %cst_21 {dimension_numbers = #tpu.dot_dimension_numbers<[1], [1], [0], [0], [0, 0, 1, 0], [], []>} : vector<16x16xf32>, vector<16x16xf32>, vector<16x16xf32> -> vector<16x16xf32>
    %cst_22 = arith.constant 2.500000e-01 : f32
    %41 = vector.broadcast %cst_22 : f32 to vector<16x16xf32>
    %42 = arith.mulf %40, %41 : vector<16x16xf32>
    %cst_23 = arith.constant dense<0xFF800000> : vector<16xf32>
    %43 = vector.multi_reduction <maximumf>, %42, %cst_23 [1] : vector<16x16xf32> to vector<16xf32>
    %44 = vector.shape_cast %43 : vector<16xf32> to vector<16x1xf32>
    %45 = vector.broadcast %44 : vector<16x1xf32> to vector<16x16xf32>
    %46 = arith.subf %42, %45 : vector<16x16xf32>
    %47 = math.exp %46 : vector<16x16xf32>
    %cst_24 = arith.constant dense<0.000000e+00> : vector<16xf32>
    %48 = vector.multi_reduction <add>, %47, %cst_24 [1] : vector<16x16xf32> to vector<16xf32>
    %49 = vector.shape_cast %48 : vector<16xf32> to vector<16x1xf32>
    %50 = vector.broadcast %49 : vector<16x1xf32> to vector<16x16xf32>
    %51 = arith.divf %47, %50 : vector<16x16xf32>
    %cst_25 = arith.constant dense<0.000000e+00> : vector<16x16xf32>
    %52 = tpu.matmul %51, %39, %cst_25 {dimension_numbers = #tpu.dot_dimension_numbers<[1], [0], [0], [1], [0, 0, 1, 1], [], []>} : vector<16x16xf32>, vector<16x16xf32>, vector<16x16xf32> -> vector<16x16xf32>
    %53 = vector.extract_strided_slice %36 {offsets = [0, 16], sizes = [16, 16], strides = [1, 1]} : vector<32x96xf32> to vector<16x16xf32>
    %54 = vector.extract_strided_slice %36 {offsets = [0, 48], sizes = [16, 16], strides = [1, 1]} : vector<32x96xf32> to vector<16x16xf32>
    %55 = vector.extract_strided_slice %36 {offsets = [0, 80], sizes = [16, 16], strides = [1, 1]} : vector<32x96xf32> to vector<16x16xf32>
    %cst_26 = arith.constant dense<0.000000e+00> : vector<16x16xf32>
    %56 = tpu.matmul %53, %54, %cst_26 {dimension_numbers = #tpu.dot_dimension_numbers<[1], [1], [0], [0], [0, 0, 1, 0], [], []>} : vector<16x16xf32>, vector<16x16xf32>, vector<16x16xf32> -> vector<16x16xf32>
    %cst_27 = arith.constant 2.500000e-01 : f32
    %57 = vector.broadcast %cst_27 : f32 to vector<16x16xf32>
    %58 = arith.mulf %56, %57 : vector<16x16xf32>
    %cst_28 = arith.constant dense<0xFF800000> : vector<16xf32>
    %59 = vector.multi_reduction <maximumf>, %58, %cst_28 [1] : vector<16x16xf32> to vector<16xf32>
    %60 = vector.shape_cast %59 : vector<16xf32> to vector<16x1xf32>
    %61 = vector.broadcast %60 : vector<16x1xf32> to vector<16x16xf32>
    %62 = arith.subf %58, %61 : vector<16x16xf32>
    %63 = math.exp %62 : vector<16x16xf32>
    %cst_29 = arith.constant dense<0.000000e+00> : vector<16xf32>
    %64 = vector.multi_reduction <add>, %63, %cst_29 [1] : vector<16x16xf32> to vector<16xf32>
    %65 = vector.shape_cast %64 : vector<16xf32> to vector<16x1xf32>
    %66 = vector.broadcast %65 : vector<16x1xf32> to vector<16x16xf32>
    %67 = arith.divf %63, %66 : vector<16x16xf32>
    %cst_30 = arith.constant dense<0.000000e+00> : vector<16x16xf32>
    %68 = tpu.matmul %67, %55, %cst_30 {dimension_numbers = #tpu.dot_dimension_numbers<[1], [0], [0], [1], [0, 0, 1, 1], [], []>} : vector<16x16xf32>, vector<16x16xf32>, vector<16x16xf32> -> vector<16x16xf32>
    %69 = tpu.concatenate %52, %68 in 1 : vector<16x16xf32>, vector<16x16xf32> -> vector<16x32xf32>
    %70 = vector.extract_strided_slice %36 {offsets = [16, 0], sizes = [16, 16], strides = [1, 1]} : vector<32x96xf32> to vector<16x16xf32>
    %71 = vector.extract_strided_slice %36 {offsets = [16, 32], sizes = [16, 16], strides = [1, 1]} : vector<32x96xf32> to vector<16x16xf32>
    %72 = vector.extract_strided_slice %36 {offsets = [16, 64], sizes = [16, 16], strides = [1, 1]} : vector<32x96xf32> to vector<16x16xf32>
    %cst_31 = arith.constant dense<0.000000e+00> : vector<16x16xf32>
    %73 = tpu.matmul %70, %71, %cst_31 {dimension_numbers = #tpu.dot_dimension_numbers<[1], [1], [0], [0], [0, 0, 1, 0], [], []>} : vector<16x16xf32>, vector<16x16xf32>, vector<16x16xf32> -> vector<16x16xf32>
    %cst_32 = arith.constant 2.500000e-01 : f32
    %74 = vector.broadcast %cst_32 : f32 to vector<16x16xf32>
    %75 = arith.mulf %73, %74 : vector<16x16xf32>
    %cst_33 = arith.constant dense<0xFF800000> : vector<16xf32>
    %76 = vector.multi_reduction <maximumf>, %75, %cst_33 [1] : vector<16x16xf32> to vector<16xf32>
    %77 = vector.shape_cast %76 : vector<16xf32> to vector<16x1xf32>
    %78 = vector.broadcast %77 : vector<16x1xf32> to vector<16x16xf32>
    %79 = arith.subf %75, %78 : vector<16x16xf32>
    %80 = math.exp %79 : vector<16x16xf32>
    %cst_34 = arith.constant dense<0.000000e+00> : vector<16xf32>
    %81 = vector.multi_reduction <add>, %80, %cst_34 [1] : vector<16x16xf32> to vector<16xf32>
    %82 = vector.shape_cast %81 : vector<16xf32> to vector<16x1xf32>
    %83 = vector.broadcast %82 : vector<16x1xf32> to vector<16x16xf32>
    %84 = arith.divf %80, %83 : vector<16x16xf32>
    %cst_35 = arith.constant dense<0.000000e+00> : vector<16x16xf32>
    %85 = tpu.matmul %84, %72, %cst_35 {dimension_numbers = #tpu.dot_dimension_numbers<[1], [0], [0], [1], [0, 0, 1, 1], [], []>} : vector<16x16xf32>, vector<16x16xf32>, vector<16x16xf32> -> vector<16x16xf32>
    %86 = vector.extract_strided_slice %36 {offsets = [16, 16], sizes = [16, 16], strides = [1, 1]} : vector<32x96xf32> to vector<16x16xf32>
    %87 = vector.extract_strided_slice %36 {offsets = [16, 48], sizes = [16, 16], strides = [1, 1]} : vector<32x96xf32> to vector<16x16xf32>
    %88 = vector.extract_strided_slice %36 {offsets = [16, 80], sizes = [16, 16], strides = [1, 1]} : vector<32x96xf32> to vector<16x16xf32>
    %cst_36 = arith.constant dense<0.000000e+00> : vector<16x16xf32>
    %89 = tpu.matmul %86, %87, %cst_36 {dimension_numbers = #tpu.dot_dimension_numbers<[1], [1], [0], [0], [0, 0, 1, 0], [], []>} : vector<16x16xf32>, vector<16x16xf32>, vector<16x16xf32> -> vector<16x16xf32>
    %cst_37 = arith.constant 2.500000e-01 : f32
    %90 = vector.broadcast %cst_37 : f32 to vector<16x16xf32>
    %91 = arith.mulf %89, %90 : vector<16x16xf32>
    %cst_38 = arith.constant dense<0xFF800000> : vector<16xf32>
    %92 = vector.multi_reduction <maximumf>, %91, %cst_38 [1] : vector<16x16xf32> to vector<16xf32>
    %93 = vector.shape_cast %92 : vector<16xf32> to vector<16x1xf32>
    %94 = vector.broadcast %93 : vector<16x1xf32> to vector<16x16xf32>
    %95 = arith.subf %91, %94 : vector<16x16xf32>
    %96 = math.exp %95 : vector<16x16xf32>
    %cst_39 = arith.constant dense<0.000000e+00> : vector<16xf32>
    %97 = vector.multi_reduction <add>, %96, %cst_39 [1] : vector<16x16xf32> to vector<16xf32>
    %98 = vector.shape_cast %97 : vector<16xf32> to vector<16x1xf32>
    %99 = vector.broadcast %98 : vector<16x1xf32> to vector<16x16xf32>
    %100 = arith.divf %96, %99 : vector<16x16xf32>
    %cst_40 = arith.constant dense<0.000000e+00> : vector<16x16xf32>
    %101 = tpu.matmul %100, %88, %cst_40 {dimension_numbers = #tpu.dot_dimension_numbers<[1], [0], [0], [1], [0, 0, 1, 1], [], []>} : vector<16x16xf32>, vector<16x16xf32>, vector<16x16xf32> -> vector<16x16xf32>
    %102 = tpu.concatenate %85, %101 in 1 : vector<16x16xf32>, vector<16x16xf32> -> vector<16x32xf32>
    %103 = tpu.concatenate %69, %102 in 0 : vector<16x32xf32>, vector<16x32xf32> -> vector<32x32xf32>
    %c0_41 = arith.constant 0 : index
    %c0_42 = arith.constant 0 : index
    %104 = vector.load %arg8[%c0_41, %c0_42] : memref<32x32xf32, #tpu.memory_space<vmem>>, vector<32x32xf32>
    %cst_43 = arith.constant dense<0.000000e+00> : vector<32x32xf32>
    %105 = tpu.matmul %103, %104, %cst_43 {dimension_numbers = #tpu.dot_dimension_numbers<[1], [0], [0], [1], [0, 0, 1, 1], [], []>} : vector<32x32xf32>, vector<32x32xf32>, vector<32x32xf32> -> vector<32x32xf32>
    %c0_44 = arith.constant 0 : index
    %c0_45 = arith.constant 0 : index
    %106 = vector.load %arg9[%c0_44, %c0_45] : memref<1x32xf32, #tpu.memory_space<vmem>>, vector<1x32xf32>
    %107 = vector.broadcast %106 : vector<1x32xf32> to vector<32x32xf32>
    %108 = arith.addf %105, %107 : vector<32x32xf32>
    %109 = arith.addf %7, %108 : vector<32x32xf32>
    %c0_46 = arith.constant 0 : index
    %c0_47 = arith.constant 0 : index
    %110 = vector.load %arg10[%c0_46, %c0_47] : memref<1x32xf32, #tpu.memory_space<vmem>>, vector<1x32xf32>
    %c0_48 = arith.constant 0 : index
    %c0_49 = arith.constant 0 : index
    %111 = vector.load %arg11[%c0_48, %c0_49] : memref<1x32xf32, #tpu.memory_space<vmem>>, vector<1x32xf32>
    %cst_50 = arith.constant dense<0.000000e+00> : vector<32xf32>
    %112 = vector.multi_reduction <add>, %109, %cst_50 [1] : vector<32x32xf32> to vector<32xf32>
    %113 = vector.shape_cast %112 : vector<32xf32> to vector<32x1xf32>
    %cst_51 = arith.constant 3.200000e+01 : f32
    %114 = vector.broadcast %cst_51 : f32 to vector<32x1xf32>
    %115 = arith.divf %113, %114 : vector<32x1xf32>
    %116 = vector.broadcast %115 : vector<32x1xf32> to vector<32x32xf32>
    %117 = arith.subf %109, %116 : vector<32x32xf32>
    %118 = arith.mulf %117, %117 : vector<32x32xf32>
    %cst_52 = arith.constant dense<0.000000e+00> : vector<32xf32>
    %119 = vector.multi_reduction <add>, %118, %cst_52 [1] : vector<32x32xf32> to vector<32xf32>
    %120 = vector.shape_cast %119 : vector<32xf32> to vector<32x1xf32>
    %cst_53 = arith.constant 3.200000e+01 : f32
    %121 = vector.broadcast %cst_53 : f32 to vector<32x1xf32>
    %122 = arith.divf %120, %121 : vector<32x1xf32>
    %123 = vector.broadcast %115 : vector<32x1xf32> to vector<32x32xf32>
    %124 = arith.subf %109, %123 : vector<32x32xf32>
    %cst_54 = arith.constant 9.99999997E-7 : f32
    %125 = vector.broadcast %cst_54 : f32 to vector<32x1xf32>
    %126 = arith.addf %122, %125 : vector<32x1xf32>
    %127 = math.rsqrt %126 : vector<32x1xf32>
    %128 = vector.broadcast %127 : vector<32x1xf32> to vector<32x32xf32>
    %129 = arith.mulf %124, %128 : vector<32x32xf32>
    %130 = vector.broadcast %110 : vector<1x32xf32> to vector<32x32xf32>
    %131 = arith.mulf %129, %130 : vector<32x32xf32>
    %132 = vector.broadcast %111 : vector<1x32xf32> to vector<32x32xf32>
    %133 = arith.addf %131, %132 : vector<32x32xf32>
    %c0_55 = arith.constant 0 : index
    %c0_56 = arith.constant 0 : index
    %134 = vector.load %arg12[%c0_55, %c0_56] : memref<32x64xf32, #tpu.memory_space<vmem>>, vector<32x64xf32>
    %cst_57 = arith.constant dense<0.000000e+00> : vector<32x64xf32>
    %135 = tpu.matmul %133, %134, %cst_57 {dimension_numbers = #tpu.dot_dimension_numbers<[1], [0], [0], [1], [0, 0, 1, 1], [], []>} : vector<32x32xf32>, vector<32x64xf32>, vector<32x64xf32> -> vector<32x64xf32>
    %c0_58 = arith.constant 0 : index
    %c0_59 = arith.constant 0 : index
    %136 = vector.load %arg13[%c0_58, %c0_59] : memref<1x64xf32, #tpu.memory_space<vmem>>, vector<1x64xf32>
    %137 = vector.broadcast %136 : vector<1x64xf32> to vector<32x64xf32>
    %138 = arith.addf %135, %137 : vector<32x64xf32>
    %cst_60 = arith.constant 5.000000e-01 : f32
    %139 = vector.broadcast %cst_60 : f32 to vector<32x64xf32>
    %140 = arith.mulf %139, %138 : vector<32x64xf32>
    %cst_61 = arith.constant 4.471500e-02 : f32
    %141 = vector.broadcast %cst_61 : f32 to vector<32x64xf32>
    %142 = arith.mulf %141, %138 : vector<32x64xf32>
    %143 = arith.mulf %142, %138 : vector<32x64xf32>
    %144 = arith.mulf %143, %138 : vector<32x64xf32>
    %145 = arith.addf %138, %144 : vector<32x64xf32>
    %cst_62 = arith.constant 0.797884583 : f32
    %146 = vector.broadcast %cst_62 : f32 to vector<32x64xf32>
    %147 = arith.mulf %146, %145 : vector<32x64xf32>
    %148 = math.tanh %147 : vector<32x64xf32>
    %cst_63 = arith.constant 1.000000e+00 : f32
    %149 = vector.broadcast %cst_63 : f32 to vector<32x64xf32>
    %150 = arith.addf %149, %148 : vector<32x64xf32>
    %151 = arith.mulf %140, %150 : vector<32x64xf32>
    %c0_64 = arith.constant 0 : index
    %c0_65 = arith.constant 0 : index
    %152 = vector.load %arg14[%c0_64, %c0_65] : memref<64x32xf32, #tpu.memory_space<vmem>>, vector<64x32xf32>
    %cst_66 = arith.constant dense<0.000000e+00> : vector<32x32xf32>
    %153 = tpu.matmul %151, %152, %cst_66 {dimension_numbers = #tpu.dot_dimension_numbers<[1], [0], [0], [1], [0, 0, 1, 1], [], []>} : vector<32x64xf32>, vector<64x32xf32>, vector<32x32xf32> -> vector<32x32xf32>
    %c0_67 = arith.constant 0 : index
    %c0_68 = arith.constant 0 : index
    %154 = vector.load %arg15[%c0_67, %c0_68] : memref<1x32xf32, #tpu.memory_space<vmem>>, vector<1x32xf32>
    %155 = vector.broadcast %154 : vector<1x32xf32> to vector<32x32xf32>
    %156 = arith.addf %153, %155 : vector<32x32xf32>
    %157 = arith.addf %109, %156 : vector<32x32xf32>
    %c0_69 = arith.constant 0 : index
    %c0_70 = arith.constant 0 : index
    %158 = vector.load %arg16[%c0_69, %c0_70] : memref<32x32xf32, #tpu.memory_space<vmem>>, vector<32x32xf32>
    %cst_71 = arith.constant dense<0.000000e+00> : vector<32x32xf32>
    %159 = tpu.matmul %157, %158, %cst_71 {dimension_numbers = #tpu.dot_dimension_numbers<[1], [0], [0], [1], [0, 0, 1, 1], [], []>} : vector<32x32xf32>, vector<32x32xf32>, vector<32x32xf32> -> vector<32x32xf32>
    %c0_72 = arith.constant 0 : index
    %c0_73 = arith.constant 0 : index
    %160 = vector.load %arg17[%c0_72, %c0_73] : memref<1x32xf32, #tpu.memory_space<vmem>>, vector<1x32xf32>
    %161 = vector.broadcast %160 : vector<1x32xf32> to vector<32x32xf32>
    %162 = arith.addf %159, %161 : vector<32x32xf32>
    %c0_74 = arith.constant 0 : index
    %c0_75 = arith.constant 0 : index
    %163 = vector.load %arg18[%c0_74, %c0_75] : memref<1x32xf32, #tpu.memory_space<vmem>>, vector<1x32xf32>
    %c0_76 = arith.constant 0 : index
    %c0_77 = arith.constant 0 : index
    %164 = vector.load %arg19[%c0_76, %c0_77] : memref<1x32xf32, #tpu.memory_space<vmem>>, vector<1x32xf32>
    %cst_78 = arith.constant dense<0.000000e+00> : vector<32xf32>
    %165 = vector.multi_reduction <add>, %162, %cst_78 [1] : vector<32x32xf32> to vector<32xf32>
    %166 = vector.shape_cast %165 : vector<32xf32> to vector<32x1xf32>
    %cst_79 = arith.constant 3.200000e+01 : f32
    %167 = vector.broadcast %cst_79 : f32 to vector<32x1xf32>
    %168 = arith.divf %166, %167 : vector<32x1xf32>
    %169 = vector.broadcast %168 : vector<32x1xf32> to vector<32x32xf32>
    %170 = arith.subf %162, %169 : vector<32x32xf32>
    %171 = arith.mulf %170, %170 : vector<32x32xf32>
    %cst_80 = arith.constant dense<0.000000e+00> : vector<32xf32>
    %172 = vector.multi_reduction <add>, %171, %cst_80 [1] : vector<32x32xf32> to vector<32xf32>
    %173 = vector.shape_cast %172 : vector<32xf32> to vector<32x1xf32>
    %cst_81 = arith.constant 3.200000e+01 : f32
    %174 = vector.broadcast %cst_81 : f32 to vector<32x1xf32>
    %175 = arith.divf %173, %174 : vector<32x1xf32>
    %176 = vector.broadcast %168 : vector<32x1xf32> to vector<32x32xf32>
    %177 = arith.subf %162, %176 : vector<32x32xf32>
    %cst_82 = arith.constant 9.99999997E-7 : f32
    %178 = vector.broadcast %cst_82 : f32 to vector<32x1xf32>
    %179 = arith.addf %175, %178 : vector<32x1xf32>
    %180 = math.rsqrt %179 : vector<32x1xf32>
    %181 = vector.broadcast %180 : vector<32x1xf32> to vector<32x32xf32>
    %182 = arith.mulf %177, %181 : vector<32x32xf32>
    %183 = vector.broadcast %163 : vector<1x32xf32> to vector<32x32xf32>
    %184 = arith.mulf %182, %183 : vector<32x32xf32>
    %185 = vector.broadcast %164 : vector<1x32xf32> to vector<32x32xf32>
    %186 = arith.addf %184, %185 : vector<32x32xf32>
    %c0_83 = arith.constant 0 : index
    %c0_84 = arith.constant 0 : index
    %187 = vector.load %arg20[%c0_83, %c0_84] : memref<32x32xf32, #tpu.memory_space<vmem>>, vector<32x32xf32>
    tpu.vector_store %arg20[%c0_83, %c0_84], %186 {strides = array<i32>} : memref<32x32xf32, #tpu.memory_space<vmem>>, vector<32x32xf32>,
    return
  }
}

</mosaic_0001>

<bundles_post_ra>
// kernel: _encode_fn.1
= control target key start
LH: loop header
LB: loop body
LE: loop exit
PB: predicated region body
PF: predicated region fallthrough
CT: control target
= control target key end

     0   :  { %s2167_s0 = inlined_call_operand.vmem [shape: f32[32,192], index: 0, kind: input, shape index: {}]   ;;  %s2168_s1 = inlined_call_operand.vmem [shape: f32[32,32], index: 1, kind: input, shape index: {}]   ;;  %s2169_s2 = inlined_call_operand.vmem [shape: f32[192,32], index: 2, kind: input, shape index: {}]   ;;  %s2170_s3 = inlined_call_operand.vmem [shape: f32[1,32], index: 3, kind: input, shape index: {}]   ;;  %s2171_s4 = inlined_call_operand.vmem [shape: f32[1,32], index: 4, kind: input, shape index: {}]   ;;  %s2172_s5 = inlined_call_operand.vmem [shape: f32[1,32], index: 5, kind: input, shape index: {}]   ;;  %s2173_s6 = inlined_call_operand.vmem [shape: f32[32,96], index: 6, kind: input, shape index: {}]   ;;  %s2174_s7 = inlined_call_operand.vmem [shape: f32[1,96], index: 7, kind: input, shape index: {}]   ;;  %s2175_s8 = inlined_call_operand.vmem [shape: f32[32,32], index: 8, kind: input, shape index: {}]   ;;  %s2176_s9 = inlined_call_operand.vmem [shape: f32[1,32], index: 9, kind: input, shape index: {}]   ;;  %s2177_s10 = inlined_call_operand.vmem [shape: f32[1,32], index: 10, kind: input, shape index: {}]   ;;  %s2178_s11 = inlined_call_operand.vmem [shape: f32[1,32], index: 11, kind: input, shape index: {}]   ;;  %s2179_s12 = inlined_call_operand.vmem [shape: f32[32,64], index: 12, kind: input, shape index: {}]   ;;  %s2180_s13 = inlined_call_operand.vmem [shape: f32[1,64], index: 13, kind: input, shape index: {}]   ;;  %s2181_s14 = inlined_call_operand.vmem [shape: f32[64,32], index: 14, kind: input, shape index: {}]   ;;  %s2182_s15 = inlined_call_operand.vmem [shape: f32[1,32], index: 15, kind: input, shape index: {}]   ;;  %s2183_s16 = inlined_call_operand.vmem [shape: f32[32,32], index: 16, kind: input, shape index: {}]   ;;  %s2184_s17 = inlined_call_operand.vmem [shape: f32[1,32], index: 17, kind: input, shape index: {}]   ;;  %s2185_s18 = inlined_call_operand.vmem [shape: f32[1,32], index: 18, kind: input, shape index: {}]   ;;  %s2186_s19 = inlined_call_operand.vmem [shape: f32[1,32], index: 19, kind: input, shape index: {}]   ;;  %s2187_s20 = inlined_call_operand.hbm [shape: f32[32,32], index: 20, kind: output, shape index: {}]  }
   0x1   :  { %2191 = sst [smem:[#allocation5_spill]] %s2167_s0 }
   0x2   :  { %2192 = sst [smem:[#allocation6_spill]] %s2168_s1 }
   0x3   :  { %2193 = sst [smem:[#allocation7_spill]] %s2169_s2 }
   0x4   :  { %2194 = sst [smem:[#allocation8_spill]] %s2170_s3 }
   0x5   :  { %2195 = sst [smem:[#allocation9_spill]] %s2171_s4 }
   0x6   :  { %s2196_s23 = sld [smem:[#allocation7_spill]] }
   0xc   :  { %v89_v0 = vld [vmem:[%s2196_s23 + $0x78] sm:$0xff]  ;;  %v88_v1 = vld [vmem:[%s2196_s23 + $0x70] sm:$0xff]  ;;  %v87_v2 = vld [vmem:[%s2196_s23 + $0x68] sm:$0xff] }
   0xd   :  { %115 = vmatpush.msra.mxu0 %v89_v0  ;;  %v97_v3 = vld [vmem:[%s2196_s23 + $0xb8] sm:$0xff]  ;;  %v86_v4 = vld [vmem:[%s2196_s23 + $0x60] sm:$0xff]  ;;  %v96_v5 = vld [vmem:[%s2196_s23 + $0xb0] sm:$0xff] }
   0xe   :  { %152 = vmatpush.msra.mxu1 %v97_v3  ;;  %v95_v6 = vld [vmem:[%s2196_s23 + $0xa8] sm:$0xff]  ;;  %v85_v7 = vld [vmem:[%s2196_s23 + $0x58] sm:$0xff]  ;;  %v94_v8 = vld [vmem:[%s2196_s23 + $0xa0] sm:$0xff] }
   0xf   :  { %116 = vmatpush.msra.mxu0 %v88_v1  ;;  %v84_v9 = vld [vmem:[%s2196_s23 + $0x50] sm:$0xff]  ;;  %v83_v10 = vld [vmem:[%s2196_s23 + $0x48] sm:$0xff]  ;;  %v93_v11 = vld [vmem:[%s2196_s23 + $0x98] sm:$0xff] }
  0x10   :  { %153 = vmatpush.msra.mxu1 %v96_v5  ;;  %v92_v12 = vld [vmem:[%s2196_s23 + $0x90] sm:$0xff]  ;;  %v82_v13 = vld [vmem:[%s2196_s23 + $0x40] sm:$0xff]  ;;  %v91_v14 = vld [vmem:[%s2196_s23 + $0x88] sm:$0xff] }
  0x11   :  { %117 = vmatpush.msra.mxu0 %v87_v2 }
  0x12   :  { %154 = vmatpush.msra.mxu1 %v95_v6 }
  0x13   :  { %118 = vmatpush.msra.mxu0 %v86_v4 }
  0x14   :  { %155 = vmatpush.msra.mxu1 %v94_v8 }
  0x15   :  { %119 = vmatpush.msra.mxu0 %v85_v7 }
  0x16   :  { %156 = vmatpush.msra.mxu1 %v93_v11 }
  0x17   :  { %120 = vmatpush.msra.mxu0 %v84_v9 }
  0x19   :  { %121 = vmatpush.msra.mxu0 %v83_v10 }
  0x1a   :  { %25 = vsyncpa [#allocation3], 0  ;;  %v81_v15 = vld [vmem:[%s2196_s23 + $0x38] sm:$0xff]  ;;  %157 = vmatpush.msra.mxu1 %v92_v12  ;;  %v90_v16 = vld [vmem:[%s2196_s23 + $0x80] sm:$0xff]  ;;  %s2197_s29 = sld [smem:[#allocation5_spill]]  ;;  %vm102_vm0 = vcmask 523264  }
  0x1b   :  { %122 = vmatpush.msra.mxu0 %v82_v13  ;;  %v80_v17 = vld [vmem:[%s2196_s23 + $0x30] sm:$0xff]  ;;  %v79_v19 = vld [vmem:[%s2196_s23 + $0x28] sm:$0xff]  ;;  %v78_v20 = vld [vmem:[%s2196_s23 + $0x20] sm:$0xff]  ;;  %s2198_s0 = sld [smem:[#allocation8_spill]]  ;;  %vm183_vm1 = vcmask 261120   ;;  %v1513_v61 = vmov 32.0  }
  0x1c   :  { %158 = vmatpush.msra.mxu1 %v91_v14  ;;  %v77_v21 = vld [vmem:[%s2196_s23 + $0x18] sm:$0xff]  ;;  %v76_v22 = vld [vmem:[%s2196_s23 + $0x10] sm:$0xff]  ;;  %v75_v24 = vld [vmem:[%s2196_s23 + $0x8] sm:$0xff]  ;;  %s2199_s22 = sld [smem:[#allocation6_spill]]  ;;  %1421 = vrcp.f32 %v1513_v61  ;;  %s1515_s3 = smov 112   ;;  %vm348_vm15 = vcmask 130048  }
  0x1d   :  { %123 = vmatpush.msra.mxu0 %v81_v15  ;;  %v74_v25 = vld [vmem:[%s2196_s23] sm:$0xff]  ;;  %s1514_s23 = smov 96   ;;  %s1516_s26 = smov 80  }
  0x1e   :  { %159 = vmatpush.msra.mxu1 %v90_v16  ;;  %s1518_s27 = smov 48   ;;  %s1519_s28 = smov 16  }
  0x1f   :  { %124 = vmatpush.msra.mxu0 %v80_v17  ;;  %s1522_s24 = smov 8  }
  0x20   :  { %v67_v18 = vld [vmem:[%s2197_s29 + $0x8] sm:$0xff]  ;;  %v69_v23 = vld [vmem:[%s2197_s29 + $0x18] sm:$0xff]  ;;  %v66_v26 = vld [vmem:[%s2197_s29] sm:$0xff] }
  0x21   :  { %1329 = vmatmul.msk.f32.vlgmr.msra.gmra.mxu1 %vm102_vm0, %v67_v18  ;;  %125 = vmatpush.msra.mxu0 %v79_v19  ;;  %v71_v27 = vld [vmem:[%s2197_s29 + $0x28] sm:$0xff]  ;;  %v68_v28 = vld [vmem:[%s2197_s29 + $0x10] sm:$0xff]  ;;  %v73_v29 = vld [vmem:[%s2197_s29 + $0x38] sm:$0xff] }
  0x22   :  { %v70_v30 = vld [vmem:[%s2197_s29 + $0x20] sm:$0xff]  ;;  %v72_v31 = vld [vmem:[%s2197_s29 + $0x30] sm:$0xff]  ;;  %v174_v43 = vld [vmem:[%s2199_s22 + $0x8] sm:$0xff]  ;;  %v1422_v62 = vpop.eup %1421  ;;  %s2200_s29 = sld [smem:[#allocation9_spill]] }
  0x23   :  { %126 = vmatpush.msra.mxu0 %v78_v20  ;;  %v1409_v33 = vld [vmem:[%s2198_s0] ss:$0 sm:$0xff]  ;;  %v175_v50 = vld [vmem:[%s2199_s22 + $0x10] sm:$0xff]  ;;  %v176_v57 = vld [vmem:[%s2199_s22 + $0x18] sm:$0xff]  ;;  %v197_v63 = vmul.f32 32.0, %v1422_v62  ;;  %vm201_vm2 = vweird.f32 %v1422_v62 }
  0x24   :  { %v173_v36 = vld [vmem:[%s2199_s22] sm:$0xff] }
  0x25   :  { %127 = vmatpush.msra.mxu0 %v77_v21  ;;  %v198_v0 = vsub.f32 1.0, %v197_v63 }
  0x27   :  { %128 = vmatpush.msra.mxu0 %v76_v22  ;;  %v199_v1 = vmul.f32 %v1422_v62, %v198_v0 }
  0x29   :  { %1330 = vmatmul.msk.f32.gmra.mxu1 %vm102_vm0, %v69_v23  ;;  %129 = vmatpush.msra.mxu0 %v75_v24  ;;  %v200_v2 = vadd.f32 %v1422_v62, %v199_v1  ;;  %v296_v24 = vld [vmem:[%s2173_s6 + $0x18] sm:$0xff] }
  0x2a   :  { %325 = vmatpush.msra.mxu2 %v296_v24 }
  0x2b   :  { %130 = vmatpush.msra.mxu0 %v74_v25  ;;  %v1759_v3 = vsel %vm201_vm2, %v1422_v62, %v200_v2  ;;  %v295_v25 = vld [vmem:[%s2173_s6 + $0x10] sm:$0xff] }
  0x2c   :  { %131 = vmatmul.f32.vlgmr.msra.gmra.mxu0 %v66_v26  ;;  %326 = vmatpush.msra.mxu2 %v295_v25  ;;  %v294_v26 = vld [vmem:[%s2173_s6 + $0x8] sm:$0xff] }
  0x2e   :  { %327 = vmatpush.msra.mxu2 %v294_v26 }
  0x31   :  { %1331 = vmatmul.msk.f32.gmra.mxu1 %vm102_vm0, %v71_v27  ;;  %v293_v27 = vld [vmem:[%s2173_s6] sm:$0xff] }
  0x32   :  { %328 = vmatpush.msra.mxu2 %v293_v27 }
  0x34   :  { %134 = vmatmul.f32.gmra.mxu0 %v68_v28 }
  0x39   :  { %1332 = vmatmul.msk.f32.gmra.mxu1 %vm102_vm0, %v73_v29 }
  0x3c   :  { %137 = vmatmul.f32.gmra.mxu0 %v70_v30 }
  0x44   :  { %140 = vmatmul.f32.gmra.mxu0 %v72_v31 }
  0x9e   :  { %v161_v32 = vpop.f32.mrf.mxu1 }
  0xa6   :  { %v164_v38 = vpop.f32.mrf.mxu1 }
  0xa9   :  { %v132_v34 = vpop.f32.mrf.mxu0 }
  0xaa   :  { %v133_v35 = vadd.f32 %v1409_v33, %v132_v34 }
  0xac   :  { %v162_v37 = vadd.f32 %v161_v32, %v133_v35 }
  0xae   :  { %v1734_v39 = vadd.f32 %v173_v36, %v162_v37  ;;  %v167_v46 = vpop.f32.mrf.mxu1 }
  0xb0   :  { %v184_v40 = vsel %vm183_vm1, %v1734_v39, 0.0 }
  0xb1   :  { %v135_v41 = vpop.f32.mrf.mxu0  ;;  %185 = vadd.xlane.f32.xlu0 %v184_v40 }
  0xb2   :  { %v136_v42 = vadd.f32 %v1409_v33, %v135_v41 }
  0xb4   :  { %v165_v44 = vadd.f32 %v164_v38, %v136_v42 }
  0xb6   :  { %v1741_v45 = vadd.f32 %v174_v43, %v165_v44  ;;  %v170_v55 = vpop.f32.mrf.mxu1 }
  0xb8   :  { %v187_v47 = vsel %vm183_vm1, %v1741_v45, 0.0 }
  0xb9   :  { %v138_v48 = vpop.f32.mrf.mxu0  ;;  %188 = vadd.xlane.f32.xlu0 %v187_v47  ;;  %v1410_v47 = vld [vmem:[%s2200_s29] ss:$0 sm:$0xff]  ;;  %s1317_s29 = sshll.u32 %s2187_s20, 4  ;;  %s1318_s29 = int_to_ptr.hbm [resolvable:$true] %s1317_s29 }
  0xba   :  { %v139_v49 = vadd.f32 %v1409_v33, %v138_v48 }
  0xbc   :  { %v168_v51 = vadd.f32 %v167_v46, %v139_v49 }
  0xbe   :  { %v1748_v52 = vadd.f32 %v175_v50, %v168_v51  ;;  %v1411_v51 = vld [vmem:[%s2172_s5] ss:$0 sm:$0xff] }
  0xc0   :  { %v190_v53 = vsel %vm183_vm1, %v1748_v52, 0.0 }
  0xc1   :  { %v141_v54 = vpop.f32.mrf.mxu0  ;;  %191 = vadd.xlane.f32.xlu2 %v190_v53 }
  0xc2   :  { %v142_v56 = vadd.f32 %v1409_v33, %v141_v54 }
  0xc4   :  { %v171_v58 = vadd.f32 %v170_v55, %v142_v56 }
  0xc6   :  { %v1755_v59 = vadd.f32 %v176_v57, %v171_v58 }
  0xc8   :  { %v193_v60 = vsel %vm183_vm1, %v1755_v59, 0.0 }
  0xc9   :  { %194 = vadd.xlane.f32.xlu2 %v193_v60 }
 0x124   :  { %v186_v4 = vpop.xlane.xlu0 %185 }
 0x125   :  { %v203_v5 = vmul.f32 %v1759_v3, %v186_v4 }
 0x127   :  { %v207_v6 = vsub.f32 %v1734_v39, %v203_v5 }
 0x129   :  { %v211_v7 = vmul.f32 %v207_v6, %v207_v6 }
 0x12b   :  { %v215_v8 = vsel %vm183_vm1, %v211_v7, 0.0 }
 0x12c   :  { %216 = vadd.xlane.f32.xlu1 %v215_v8  ;;  %v189_v9 = vpop.xlane.xlu0 %188 }
 0x12d   :  { %v204_v10 = vmul.f32 %v1759_v3, %v189_v9 }
 0x12f   :  { %v1766_v11 = vsub.f32 %v1741_v45, %v204_v10 }
 0x131   :  { %v212_v12 = vmul.f32 %v1766_v11, %v1766_v11 }
 0x133   :  { %v218_v13 = vsel %vm183_vm1, %v212_v12, 0.0 }
 0x134   :  { %v192_v14 = vpop.xlane.xlu2 %191  ;;  %219 = vadd.xlane.f32.xlu1 %v218_v13 }
 0x135   :  { %v205_v15 = vmul.f32 %v1759_v3, %v192_v14 }
 0x137   :  { %v1773_v16 = vsub.f32 %v1748_v52, %v205_v15 }
 0x139   :  { %v213_v17 = vmul.f32 %v1773_v16, %v1773_v16 }
 0x13b   :  { %v221_v18 = vsel %vm183_vm1, %v213_v17, 0.0 }
 0x13c   :  { %v195_v19 = vpop.xlane.xlu2 %194  ;;  %222 = vadd.xlane.f32.xlu0 %v221_v18 }
 0x13d   :  { %v206_v20 = vmul.f32 %v1759_v3, %v195_v19 }
 0x13f   :  { %v1780_v21 = vsub.f32 %v1755_v59, %v206_v20 }
 0x141   :  { %v214_v22 = vmul.f32 %v1780_v21, %v1780_v21 }
 0x143   :  { %v224_v23 = vsel %vm183_vm1, %v214_v22, 0.0 }
 0x144   :  { %225 = vadd.xlane.f32.xlu1 %v224_v23 }
 0x19f   :  { %v217_v28 = vpop.xlane.xlu1 %216 }
 0x1a0   :  { %v227_v29 = vmul.f32 %v217_v28, %v1759_v3 }
 0x1a2   :  { %v231_v30 = vadd.f32 1e-06, %v227_v29 }
 0x1a4   :  { %1423 = vrsqrt.f32 %v231_v30  ;;  %vm241_vm4 = vweird.f32 %v231_v30 }
 0x1a7   :  { %v220_v31 = vpop.xlane.xlu1 %219 }
 0x1a8   :  { %v228_v32 = vmul.f32 %v220_v31, %v1759_v3 }
 0x1aa   :  { %v1424_v33 = vpop.eup %1423  ;;  %v232_v34 = vadd.f32 1e-06, %v228_v32 }
 0x1ab   :  { %v236_v35 = vmul.f32 %v1424_v33, %v231_v30  ;;  %vm242_vm3 = vweird.f32 %v1424_v33 }
 0x1ac   :  { %1425 = vrsqrt.f32 %v232_v34  ;;  %vm243_vm5 = vmor %vm241_vm4, %vm242_vm3  ;;  %vm251_vm7 = vweird.f32 %v232_v34 }
 0x1ad   :  { %v237_v36 = vmul.f32 %v1424_v33, %v236_v35 }
 0x1af   :  { %v238_v37 = vmul.f32 0.5, %v237_v36  ;;  %v223_v38 = vpop.xlane.xlu0 %222 }
 0x1b0   :  { %v229_v40 = vmul.f32 %v223_v38, %v1759_v3 }
 0x1b1   :  { %v239_v41 = vsub.f32 1.5, %v238_v37 }
 0x1b2   :  { %v1426_v42 = vpop.eup %1425  ;;  %v233_v43 = vadd.f32 1e-06, %v229_v40 }
 0x1b3   :  { %v240_v44 = vmul.f32 %v1424_v33, %v239_v41  ;;  %v246_v46 = vmul.f32 %v1426_v42, %v232_v34  ;;  %vm252_vm6 = vweird.f32 %v1426_v42 }
 0x1b4   :  { %1427 = vrsqrt.f32 %v233_v43  ;;  %vm253_vm8 = vmor %vm251_vm7, %vm252_vm6  ;;  %vm261_vm9 = vweird.f32 %v233_v43 }
 0x1b5   :  { %v244_v48 = vsel %vm243_vm5, %v1424_v33, %v240_v44  ;;  %v247_v49 = vmul.f32 %v1426_v42, %v246_v46 }
 0x1b6   :  { %v275_v50 = vmul.f32 %v244_v48, %v207_v6 }
 0x1b7   :  { %v248_v53 = vmul.f32 0.5, %v247_v49  ;;  %v226_v54 = vpop.xlane.xlu1 %225 }
 0x1b8   :  { %v230_v55 = vmul.f32 %v226_v54, %v1759_v3  ;;  %v282_v56 = vmul.f32 %v1410_v47, %v275_v50 }
 0x1b9   :  { %v249_v57 = vsub.f32 1.5, %v248_v53 }
 0x1ba   :  { %v1428_v58 = vpop.eup %1427  ;;  %v234_v60 = vadd.f32 1e-06, %v230_v55  ;;  %v289_v61 = vadd.f32 %v1411_v51, %v282_v56 }
 0x1bb   :  { %v250_v62 = vmul.f32 %v1426_v42, %v249_v57  ;;  %v256_v63 = vmul.f32 %v1428_v58, %v233_v43  ;;  %vm262_vm10 = vweird.f32 %v1428_v58 }
 0x1bc   :  { %1429 = vrsqrt.f32 %v234_v60  ;;  %1333 = vmatmul.msk.f32.vlgmr.msra.gmra.mxu2 %vm183_vm1, %v289_v61  ;;  %vm263_vm11 = vmor %vm261_vm9, %vm262_vm10  ;;  %vm271_vm12 = vweird.f32 %v234_v60 }
 0x1bd   :  { %v254_v0 = vsel %vm253_vm8, %v1426_v42, %v250_v62  ;;  %v257_v1 = vmul.f32 %v1428_v58, %v256_v63 }
 0x1be   :  { %v276_v2 = vmul.f32 %v254_v0, %v1766_v11 }
 0x1bf   :  { %v258_v4 = vmul.f32 0.5, %v257_v1 }
 0x1c0   :  { %v283_v5 = vmul.f32 %v1410_v47, %v276_v2 }
 0x1c1   :  { %v259_v6 = vsub.f32 1.5, %v258_v4 }
 0x1c2   :  { %v1430_v7 = vpop.eup %1429  ;;  %v290_v8 = vadd.f32 %v1411_v51, %v283_v5 }
 0x1c3   :  { %v260_v9 = vmul.f32 %v1428_v58, %v259_v6  ;;  %v266_v10 = vmul.f32 %v1430_v7, %v234_v60  ;;  %vm272_vm13 = vweird.f32 %v1430_v7 }
 0x1c4   :  { %1334 = vmatmul.msk.f32.gmra.mxu2 %vm183_vm1, %v290_v8  ;;  %vm273_vm14 = vmor %vm271_vm12, %vm272_vm13 }
 0x1c5   :  { %v264_v12 = vsel %vm263_vm11, %v1428_v58, %v260_v9  ;;  %v267_v13 = vmul.f32 %v1430_v7, %v266_v10 }
 0x1c6   :  { %v277_v14 = vmul.f32 %v264_v12, %v1773_v16  ;;  %v1817_v16 = vld [vmem:[%s2174_s7] ss:$0 sm:$0xff]  ;;  %s1517_s7 = smov 64  }
 0x1c7   :  { %v268_v15 = vmul.f32 0.5, %v267_v13 }
 0x1c8   :  { %v284_v11 = vmul.f32 %v1410_v47, %v277_v14 }
 0x1c9   :  { %v269_v17 = vsub.f32 1.5, %v268_v15 }
 0x1ca   :  { %v291_v18 = vadd.f32 %v1411_v51, %v284_v11 }
 0x1cb   :  { %v270_v19 = vmul.f32 %v1430_v7, %v269_v17 }
 0x1cc   :  { %1335 = vmatmul.msk.f32.gmra.mxu2 %vm183_vm1, %v291_v18 }
 0x1cd   :  { %v274_v20 = vsel %vm273_vm14, %v1430_v7, %v270_v19 }
 0x1ce   :  { %v278_v22 = vmul.f32 %v274_v20, %v1780_v21 }
 0x1d0   :  { %v285_v23 = vmul.f32 %v1410_v47, %v278_v22 }
 0x1d2   :  { %v292_v24 = vadd.f32 %v1411_v51, %v285_v23 }
 0x1d4   :  { %1336 = vmatmul.msk.f32.gmra.mxu2 %vm183_vm1, %v292_v24 }
 0x23f   :  { %v330_v25 = vpop.f32.mrf.mxu2 }
 0x240   :  { %v1820_v26 = vadd.f32 %v1817_v16, %v330_v25 }
 0x242   :  { %344 = vrot.lane.b32.xlu0 %v1820_v26, %s1514_s23 }
 0x247   :  { %v333_v27 = vpop.f32.mrf.mxu2 }
 0x248   :  { %v1825_v21 = vadd.f32 %v1817_v16, %v333_v27 }
 0x24a   :  { %465 = vrot.lane.b32.xlu0 %v1820_v26, %s1515_s3  ;;  %471 = vrot.lane.b32.xlu1 %v1825_v21, %s1516_s26  ;;  %v1389_v9 = vpack.i.bf16 %v1820_v26, %v1825_v21 }
 0x24b   :  { %346 = vrot.lane.b32.xlu2 %v1825_v21, %s1514_s23 }
 0x24f   :  { %v336_v28 = vpop.f32.mrf.mxu2 }
 0x250   :  { %v1834_v29 = vadd.f32 %v1817_v16, %v336_v28 }
 0x253   :  { %469 = vrot.lane.b32.xlu2 %v1820_v26, %s1516_s26 }
 0x257   :  { %v339_v40 = vpop.f32.mrf.mxu2 }
 0x258   :  { %v1879_v12 = vadd.f32 %v1817_v16, %v339_v40 }
 0x25b   :  { %467 = vrot.lane.b32.xlu2 %v1825_v21, %s1515_s3 }
 0x2a5   :  { %v347_v30 = vpop.permute.xlu2 %346 }
 0x2a6   :  { %1337 = vmatpush.xpose.msk.msra.mxu3 %vm348_vm15, %v347_v30 }
 0x2ad   :  { %v470_v33 = vpop.permute.xlu2 %469 }
 0x2b4   :  { %v345_v31 = vpop.permute.xlu0 %344 }
 0x2b5   :  { %1338 = vmatpush.xpose.msk.msra.mxu3 %vm348_vm15, %v345_v31  ;;  %v468_v35 = vpop.permute.xlu2 %467 }
 0x2b8   :  { %1339 = vmatmul.msk.f32.vlgmr.msra.gmra.mxu3 %vm348_vm15, %v1820_v26 }
 0x2bc   :  { %v472_v32 = vpop.permute.xlu1 %471  ;;  %v466_v34 = vpop.permute.xlu0 %465 }
 0x2bd   :  { %1343 = vmatpush.xpose.msk.msrb.mxu2 %vm348_vm15, %v472_v32 }
 0x2c0   :  { %1340 = vmatmul.msk.f32.gmra.mxu3 %vm348_vm15, %v1825_v21 }
 0x2c1   :  { %1344 = vmatpush.xpose.msk.msrb.mxu2 %vm348_vm15, %v470_v33 }
 0x2c4   :  { %1345 = vmatmul.msk.f32.vlgmr.msrb.gmra.mxu2 %vm348_vm15, %v466_v34 }
 0x2cc   :  { %1346 = vmatmul.msk.f32.gmra.mxu2 %vm348_vm15, %v468_v35 }
 0x33b   :  { %v374_v36 = vpop.f32.mrf.mxu3 }
 0x33c   :  { %v380_v37 = vmul.f32 0.25, %v374_v36 }
 0x33e   :  { %v382_v38 = vsel %vm348_vm15, %v380_v37, -inf }
 0x33f   :  { %383 = vmax.xlane.f32.xlu1 %v382_v38 }
 0x343   :  { %v377_v41 = vpop.f32.mrf.mxu3 }
 0x344   :  { %v381_v42 = vmul.f32 0.25, %v377_v41 }
 0x346   :  { %v385_v43 = vsel %vm348_vm15, %v381_v42, -inf }
 0x347   :  { %386 = vmax.xlane.f32.xlu0 %v385_v43  ;;  %v498_v44 = vpop.f32.mrf.mxu2 }
 0x348   :  { %v504_v46 = vmul.f32 0.25, %v498_v44 }
 0x34a   :  { %v506_v47 = vsel %vm348_vm15, %v504_v46, -inf }
 0x34b   :  { %507 = vmax.xlane.f32.xlu2 %v506_v47 }
 0x34f   :  { %v501_v48 = vpop.f32.mrf.mxu2 }
 0x350   :  { %v505_v49 = vmul.f32 0.25, %v501_v48 }
 0x352   :  { %v509_v50 = vsel %vm348_vm15, %v505_v49, -inf }
 0x353   :  { %510 = vmax.xlane.f32.xlu1 %v509_v50 }
 0x3b2   :  { %v384_v51 = vpop.xlane.xlu1 %383 }
 0x3b3   :  { %v388_v53 = vsub.f32 %v380_v37, %v384_v51 }
 0x3b5   :  { %v390_v54 = vmul.f32 1.442695, %v388_v53 }
 0x3b7   :  { %1431 = vpow2.f32 %v390_v54 }
 0x3ba   :  { %v387_v55 = vpop.xlane.xlu0 %386 }
 0x3bb   :  { %v389_v56 = vsub.f32 %v381_v42, %v387_v55 }
 0x3bd   :  { %v1854_v57 = vpop.eup %1431  ;;  %v392_v58 = vmul.f32 1.442695, %v389_v56 }
 0x3be   :  { %v508_v60 = vpop.xlane.xlu2 %507  ;;  %v394_v61 = vsel %vm348_vm15, %v1854_v57, 0.0 }
 0x3bf   :  { %1433 = vpow2.f32 %v392_v58  ;;  %v512_v62 = vsub.f32 %v504_v46, %v508_v60  ;;  %395 = vadd.xlane.f32.xlu0 %v394_v61 }
 0x3c1   :  { %v514_v63 = vmul.f32 1.442695, %v512_v62 }
 0x3c3   :  { %1435 = vpow2.f32 %v514_v63 }
 0x3c5   :  { %v1858_v0 = vpop.eup %1433 }
 0x3c6   :  { %v511_v1 = vpop.xlane.xlu1 %510  ;;  %v397_v2 = vsel %vm348_vm15, %v1858_v0, 0.0 }
 0x3c7   :  { %v513_v4 = vsub.f32 %v505_v49, %v511_v1  ;;  %398 = vadd.xlane.f32.xlu2 %v397_v2 }
 0x3c9   :  { %v1862_v5 = vpop.eup %1435  ;;  %v516_v6 = vmul.f32 1.442695, %v513_v4 }
 0x3ca   :  { %v518_v7 = vsel %vm348_vm15, %v1862_v5, 0.0 }
 0x3cb   :  { %1437 = vpow2.f32 %v516_v6  ;;  %519 = vadd.xlane.f32.xlu1 %v518_v7 }
 0x3d1   :  { %v1866_v8 = vpop.eup %1437 }
 0x3d2   :  { %v521_v10 = vsel %vm348_vm15, %v1866_v8, 0.0 }
 0x3d3   :  { %1390 = vrot.lane.b32.xlu0 %v1389_v9, %s1517_s7  ;;  %522 = vadd.xlane.f32.xlu2 %v521_v10 }
 0x3db   :  { %725 = vrot.lane.b32.xlu0 %v1834_v29, %s1516_s26 }
 0x3e3   :  { %721 = vrot.lane.b32.xlu0 %v1834_v29, %s1515_s3 }
 0x3e4   :  { %1395 = vrot.lane.b32.xlu1 %v1389_v9, %s1518_s27 }
 0x3eb   :  { %601 = vrot.lane.b32.xlu0 %v1834_v29, %s1514_s23  ;;  %727 = vrot.lane.b32.xlu2 %v1879_v12, %s1516_s26 }
 0x3ec   :  { %723 = vrot.lane.b32.xlu1 %v1879_v12, %s1515_s3 }
 0x3f3   :  { %603 = vrot.lane.b32.xlu2 %v1879_v12, %s1514_s23 }
 0x432   :  { %v396_v13 = vpop.xlane.xlu0 %395 }
 0x433   :  { %1439 = vrcp.f32 %v396_v13  ;;  %v411_v22 = vand.u32 2147483648, %v396_v13  ;;  %vm405_vm3 = vweird.f32 %v396_v13  ;;  %v409_v24 = vand.u32 2147483647, %v396_v13 }
 0x435   :  { %v412_v26 = vor.u32 1.1754944e-38, %v411_v22  ;;  %vm410_vm5 = vcmp.eq.f32.partialorder %v409_v24, 8.507059e+37 }
 0x439   :  { %v1440_v14 = vpop.eup %1439 }
 0x43a   :  { %v401_v15 = vmul.f32 %v1440_v14, %v396_v13  ;;  %v399_v11 = vpop.xlane.xlu2 %398  ;;  %vm406_vm2 = vweird.f32 %v1440_v14 }
 0x43b   :  { %1441 = vrcp.f32 %v399_v11  ;;  %vm407_vm4 = vmor %vm405_vm3, %vm406_vm2  ;;  %v426_v35 = vand.u32 2147483648, %v399_v11  ;;  %vm420_vm7 = vweird.f32 %v399_v11  ;;  %v424_v41 = vand.u32 2147483647, %v399_v11 }
 0x43c   :  { %v402_v17 = vsub.f32 1.0, %v401_v15 }
 0x43d   :  { %v427_v43 = vor.u32 1.1754944e-38, %v426_v35  ;;  %vm425_vm9 = vcmp.eq.f32.partialorder %v424_v41, 8.507059e+37 }
 0x43e   :  { %v403_v18 = vmul.f32 %v1440_v14, %v402_v17  ;;  %v520_v19 = vpop.xlane.xlu1 %519 }
 0x43f   :  { %1443 = vrcp.f32 %v520_v19  ;;  %v535_v54 = vand.u32 2147483648, %v520_v19  ;;  %vm529_vm11 = vweird.f32 %v520_v19  ;;  %v533_v56 = vand.u32 2147483647, %v520_v19 }
 0x440   :  { %v404_v20 = vadd.f32 %v1440_v14, %v403_v18 }
 0x441   :  { %v1442_v23 = vpop.eup %1441  ;;  %v536_v60 = vor.u32 1.1754944e-38, %v535_v54  ;;  %vm534_vm13 = vcmp.eq.f32.partialorder %v533_v56, 8.507059e+37 }
 0x442   :  { %v416_v16 = vmul.f32 %v1442_v23, %v399_v11  ;;  %v408_v25 = vsel %vm407_vm4, %v1440_v14, %v404_v20  ;;  %vm421_vm6 = vweird.f32 %v1442_v23 }
 0x443   :  { %v413_v34 = vsel %vm410_vm5, %v412_v26, %v408_v25  ;;  %vm422_vm8 = vmor %vm420_vm7, %vm421_vm6 }
 0x444   :  { %v417_v27 = vsub.f32 1.0, %v416_v16  ;;  %v414_v40 = vmul.f32 %v1854_v57, %v413_v34 }
 0x445   :  { %v1444_v21 = vpop.eup %1443  ;;  %v1391_v28 = vpop.permute.xlu0 %1390 }
 0x446   :  { %v418_v30 = vmul.f32 %v1442_v23, %v417_v27  ;;  %v525_v31 = vmul.f32 %v1444_v21, %v520_v19  ;;  %v523_v32 = vpop.xlane.xlu2 %522  ;;  %v1392_v33 = vunpack.i.l.bf16 %v1391_v28  ;;  %v1393_v37 = vunpack.i.h.bf16 %v1391_v28 }
 0x447   :  { %1445 = vrcp.f32 %v523_v32  ;;  %vm530_vm10 = vweird.f32 %v1444_v21  ;;  %v550_v6 = vand.u32 2147483648, %v523_v32  ;;  %vm544_vm2 = vweird.f32 %v523_v32 }
 0x448   :  { %v526_v36 = vsub.f32 1.0, %v525_v31  ;;  %456 = vmatpush.msrb.mxu3 %v1392_v33  ;;  %v419_v38 = vadd.f32 %v1442_v23, %v418_v30  ;;  %vm531_vm12 = vmor %vm529_vm11, %vm530_vm10  ;;  %v548_v9 = vand.u32 2147483647, %v523_v32 }
 0x449   :  { %v551_v13 = vor.u32 1.1754944e-38, %v550_v6 }
 0x44a   :  { %457 = vmatpush.msrb.mxu3 %v1393_v37  ;;  %v423_v42 = vsel %vm422_vm8, %v1442_v23, %v419_v38  ;;  %v527_v44 = vmul.f32 %v1444_v21, %v526_v36  ;;  %vm549_vm4 = vcmp.eq.f32.partialorder %v548_v9, 8.507059e+37 }
 0x44b   :  { %1341 = vmatmul.msk.f32.vlgmr.msrb.gmra.mxu3 %vm348_vm15, %v414_v40  ;;  %v428_v50 = vsel %vm425_vm9, %v427_v43, %v423_v42 }
 0x44c   :  { %v528_v51 = vadd.f32 %v1444_v21, %v527_v44  ;;  %v429_v55 = vmul.f32 %v1858_v0, %v428_v50 }
 0x44d   :  { %v1446_v46 = vpop.eup %1445  ;;  %v726_v47 = vpop.permute.xlu0 %725 }
 0x44e   :  { %v540_v48 = vmul.f32 %v1446_v46, %v523_v32  ;;  %v728_v49 = vpop.permute.xlu2 %727  ;;  %v532_v57 = vsel %vm531_vm12, %v1444_v21, %v528_v51  ;;  %vm545_vm14 = vweird.f32 %v1446_v46  ;;  %v1399_v32 = vpack.i.bf16 %v1834_v29, %v1879_v12 }
 0x44f   :  { %v537_v1 = vsel %vm534_vm13, %v536_v60, %v532_v57  ;;  %vm546_vm3 = vmor %vm544_vm2, %vm545_vm14  ;;  %v858_v57 = vld [vmem:[%s2175_s8 + $0x18] sm:$0xff]  ;;  %v856_v60 = vld [vmem:[%s2175_s8 + $0x8] sm:$0xff] }
 0x450   :  { %v541_v53 = vsub.f32 1.0, %v540_v48  ;;  %v538_v7 = vmul.f32 %v1862_v5, %v537_v1 }
 0x452   :  { %v542_v58 = vmul.f32 %v1446_v46, %v541_v53 }
 0x453   :  { %1342 = vmatmul.msk.f32.gmra.mxu3 %vm348_vm15, %v429_v55 }
 0x454   :  { %v543_v4 = vadd.f32 %v1446_v46, %v542_v58  ;;  %v857_v58 = vld [vmem:[%s2175_s8 + $0x10] sm:$0xff] }
 0x455   :  { %v722_v61 = vpop.permute.xlu0 %721 }
 0x456   :  { %v1396_v62 = vpop.permute.xlu1 %1395  ;;  %v604_v63 = vpop.permute.xlu2 %603  ;;  %v547_v10 = vsel %vm546_vm3, %v1446_v46, %v543_v4 }
 0x457   :  { %v1397_v2 = vunpack.i.l.bf16 %v1396_v62  ;;  %1349 = vmatpush.xpose.msk.msrb.mxu1 %vm348_vm15, %v604_v63  ;;  %v1398_v0 = vunpack.i.h.bf16 %v1396_v62  ;;  %v552_v15 = vsel %vm549_vm4, %v551_v13, %v547_v10  ;;  %v855_v62 = vld [vmem:[%s2175_s8] sm:$0xff]  ;;  %s1521_s8 = smov 128  }
 0x458   :  { %v553_v5 = vmul.f32 %v1866_v8, %v552_v15 }
 0x459   :  { %580 = vmatpush.msra.mxu3 %v1397_v2 }
 0x45b   :  { %581 = vmatpush.msra.mxu3 %v1398_v0 }
 0x45c   :  { %1347 = vmatmul.msk.f32.vlgmr.msra.gmra.mxu3 %vm348_vm15, %v538_v7 }
 0x45d   :  { %1355 = vmatpush.xpose.msk.msrb.mxu3 %vm348_vm15, %v728_v49  ;;  %v602_v14 = vpop.permute.xlu0 %601 }
 0x45e   :  { %1350 = vmatpush.xpose.msk.msrb.mxu1 %vm348_vm15, %v602_v14  ;;  %v724_v11 = vpop.permute.xlu1 %723 }
 0x461   :  { %1356 = vmatpush.xpose.msk.msrb.mxu3 %vm348_vm15, %v726_v47  ;;  %1351 = vmatmul.msk.f32.vlgmr.msrb.gmra.mxu1 %vm348_vm15, %v1834_v29 }
 0x464   :  { %1348 = vmatmul.msk.f32.gmra.mxu3 %vm348_vm15, %v553_v5 }
 0x469   :  { %1352 = vmatmul.msk.f32.gmra.mxu1 %vm348_vm15, %v1879_v12 }
 0x46c   :  { %1357 = vmatmul.msk.f32.vlgmr.msrb.gmra.mxu3 %vm348_vm15, %v722_v61 }
 0x474   :  { %1358 = vmatmul.msk.f32.gmra.mxu3 %vm348_vm15, %v724_v11 }
 0x4ce   :  { %v1907_v17 = vpop.f32.mrf.mxu3 }
 0x4d6   :  { %v1909_v18 = vpop.f32.mrf.mxu3 }
 0x4de   :  { %v630_v19 = vpop.f32.mrf.mxu1 }
 0x4df   :  { %v636_v20 = vmul.f32 0.25, %v630_v19  ;;  %v583_v22 = vpop.f32.mrf.mxu3 }
 0x4e1   :  { %v638_v23 = vsel %vm348_vm15, %v636_v20, -inf }
 0x4e2   :  { %639 = vmax.xlane.f32.xlu0 %v638_v23 }
 0x4e6   :  { %v633_v26 = vpop.f32.mrf.mxu1 }
 0x4e7   :  { %v586_v8 = vpop.f32.mrf.mxu3  ;;  %v637_v27 = vmul.f32 0.25, %v633_v26 }
 0x4e9   :  { %v641_v30 = vsel %vm348_vm15, %v637_v27, -inf }
 0x4ef   :  { %v754_v24 = vpop.f32.mrf.mxu3 }
 0x4f0   :  { %v760_v16 = vmul.f32 0.25, %v754_v24 }
 0x4f2   :  { %v762_v25 = vsel %vm348_vm15, %v760_v16, -inf }
 0x4f3   :  { %763 = vmax.xlane.f32.xlu1 %v762_v25 }
 0x4f7   :  { %v757_v21 = vpop.f32.mrf.mxu3 }
 0x4f8   :  { %v761_v28 = vmul.f32 0.25, %v757_v21 }
 0x4fa   :  { %v765_v31 = vsel %vm348_vm15, %v761_v28, -inf }
 0x4fb   :  { %642 = vmax.xlane.f32.xlu1 %v641_v30  ;;  %766 = vmax.xlane.f32.xlu2 %v765_v31 }
 0x514   :  { %1400 = vrot.lane.b32.xlu1 %v1399_v32, %s1518_s27 }
 0x51c   :  { %593 = vrot.lane.b32.xlu1 %v586_v8, %s1519_s28 }
 0x555   :  { %v640_v33 = vpop.xlane.xlu0 %639 }
 0x556   :  { %v644_v36 = vsub.f32 %v636_v20, %v640_v33 }
 0x558   :  { %v646_v38 = vmul.f32 1.442695, %v644_v36 }
 0x566   :  { %v764_v34 = vpop.xlane.xlu1 %763 }
 0x567   :  { %v768_v35 = vsub.f32 %v760_v16, %v764_v34 }
 0x569   :  { %v770_v37 = vmul.f32 1.442695, %v768_v35 }
 0x56b   :  { %1447 = vpow2.f32 %v770_v37 }
 0x56c   :  { %1449 = vpow2.f32 %v646_v38 }
 0x56e   :  { %v767_v40 = vpop.xlane.xlu2 %766  ;;  %v643_v41 = vpop.xlane.xlu1 %642 }
 0x56f   :  { %v769_v42 = vsub.f32 %v761_v28, %v767_v40  ;;  %v645_v29 = vsub.f32 %v637_v27, %v643_v41 }
 0x571   :  { %v1919_v43 = vpop.eup %1447  ;;  %v772_v44 = vmul.f32 1.442695, %v769_v42  ;;  %v648_v46 = vmul.f32 1.442695, %v645_v29 }
 0x572   :  { %v774_v12 = vsel %vm348_vm15, %v1919_v43, 0.0  ;;  %v1923_v47 = vpop.eup %1449 }
 0x573   :  { %775 = vadd.xlane.f32.xlu2 %v774_v12  ;;  %1451 = vpow2.f32 %v772_v44  ;;  %v650_v49 = vsel %vm348_vm15, %v1923_v47, 0.0 }
 0x574   :  { %1453 = vpow2.f32 %v648_v46 }
 0x579   :  { %v1925_v48 = vpop.eup %1451 }
 0x57a   :  { %v777_v50 = vsel %vm348_vm15, %v1925_v48, 0.0  ;;  %v1931_v51 = vpop.eup %1453 }
 0x57b   :  { %651 = vadd.xlane.f32.xlu2 %v650_v49  ;;  %778 = vadd.xlane.f32.xlu0 %v777_v50  ;;  %v653_v53 = vsel %vm348_vm15, %v1931_v51, 0.0 }
 0x583   :  { %654 = vadd.xlane.f32.xlu0 %v653_v53 }
 0x586   :  { %v1401_v54 = vpop.permute.xlu1 %1400 }
 0x587   :  { %v1402_v55 = vunpack.i.l.bf16 %v1401_v54  ;;  %v1403_v56 = vunpack.i.h.bf16 %v1401_v54 }
 0x589   :  { %836 = vmatpush.msrb.mxu0 %v1402_v55  ;;  %1377 = vmatpush.msra.mxu1 %v1402_v55 }
 0x58b   :  { %837 = vmatpush.msrb.mxu0 %v1403_v56  ;;  %1378 = vmatpush.msra.mxu1 %v1403_v56 }
 0x58d   :  { %887 = vmatpush.msrb.mxu1 %v858_v57 }
 0x58f   :  { %888 = vmatpush.msrb.mxu1 %v857_v58 }
 0x591   :  { %889 = vmatpush.msrb.mxu1 %v856_v60  ;;  %v594_v60 = vpop.permute.xlu1 %593 }
 0x593   :  { %1405 = vrot.lane.b32.xlu2 %v1399_v32, %s1517_s7  ;;  %890 = vmatpush.msrb.mxu1 %v855_v62 }
 0x597   :  { %591 = vrot.lane.b32.xlu0 %v583_v22, %s1519_s28 }
 0x5e6   :  { %v776_v61 = vpop.xlane.xlu2 %775 }
 0x5e7   :  { %1455 = vrcp.f32 %v776_v61  ;;  %v791_v7 = vand.u32 2147483648, %v776_v61  ;;  %vm785_vm6 = vweird.f32 %v776_v61  ;;  %v789_v10 = vand.u32 2147483647, %v776_v61 }
 0x5e9   :  { %v792_v20 = vor.u32 1.1754944e-38, %v791_v7  ;;  %vm790_vm8 = vcmp.eq.f32.partialorder %v789_v10, 8.507059e+37 }
 0x5ed   :  { %v1456_v63 = vpop.eup %1455 }
 0x5ee   :  { %v781_v1 = vmul.f32 %v1456_v63, %v776_v61  ;;  %v652_v2 = vpop.xlane.xlu2 %651  ;;  %v779_v4 = vpop.xlane.xlu0 %778  ;;  %vm786_vm5 = vweird.f32 %v1456_v63  ;;  %v598_v61 = vsel %vm348_vm15, %v1909_v18, %v594_v60 }
 0x5ef   :  { %1457 = vrcp.f32 %v652_v2  ;;  %vm1949_vm7 = vmor %vm785_vm6, %vm786_vm5  ;;  %v665_v16 = vand.u32 2147483647, %v652_v2  ;;  %v667_v26 = vand.u32 2147483648, %v652_v2  ;;  %v806_v28 = vand.u32 2147483648, %v779_v4 }
 0x5f0   :  { %v782_v6 = vsub.f32 1.0, %v781_v1  ;;  %1459 = vrcp.f32 %v779_v4  ;;  %v804_v33 = vand.u32 2147483647, %v779_v4  ;;  %vm661_vm11 = vweird.f32 %v652_v2 }
 0x5f1   :  { %vm800_vm12 = vweird.f32 %v779_v4  ;;  %v668_v36 = vor.u32 1.1754944e-38, %v667_v26  ;;  %v807_v38 = vor.u32 1.1754944e-38, %v806_v28  ;;  %vm666_vm2 = vcmp.eq.f32.partialorder %v665_v16, 8.507059e+37 }
 0x5f2   :  { %v783_v0 = vmul.f32 %v1456_v63, %v782_v6  ;;  %vm805_vm3 = vcmp.eq.f32.partialorder %v804_v33, 8.507059e+37  ;;  %v1012_v33 = vld [vmem:[%s2179_s12] sm:$0xff] }
 0x5f4   :  { %v784_v9 = vadd.f32 %v1456_v63, %v783_v0 }
 0x5f5   :  { %v1458_v13 = vpop.eup %1457 }
 0x5f6   :  { %v1460_v15 = vpop.eup %1459  ;;  %v657_v5 = vmul.f32 %v1458_v13, %v652_v2  ;;  %v1406_v11 = vpop.permute.xlu2 %1405  ;;  %v788_v19 = vsel %vm1949_vm7, %v1456_v63, %v784_v9  ;;  %vm662_vm9 = vweird.f32 %v1458_v13 }
 0x5f7   :  { %v796_v22 = vmul.f32 %v1460_v15, %v779_v4  ;;  %v655_v23 = vpop.xlane.xlu0 %654  ;;  %v1407_v8 = vunpack.i.l.bf16 %v1406_v11  ;;  %v1408_v27 = vunpack.i.h.bf16 %v1406_v11  ;;  %v793_v21 = vsel %vm790_vm8, %v792_v20, %v788_v19  ;;  %vm663_vm13 = vmor %vm661_vm11, %vm662_vm9 }
 0x5f8   :  { %v658_v24 = vsub.f32 1.0, %v657_v5  ;;  %1461 = vrcp.f32 %v655_v23  ;;  %v794_v31 = vmul.f32 %v1919_v43, %v793_v21  ;;  %vm801_vm10 = vweird.f32 %v1460_v15  ;;  %v1015_v21 = vld [vmem:[%s2179_s12 + $0x18] sm:$0xff] }
 0x5f9   :  { %v797_v25 = vsub.f32 1.0, %v796_v22  ;;  %712 = vmatpush.msra.mxu2 %v1407_v8  ;;  %vm802_vm14 = vmor %vm800_vm12, %vm801_vm10  ;;  %v682_v49 = vand.u32 2147483648, %v655_v23  ;;  %v680_v53 = vand.u32 2147483647, %v655_v23  ;;  %vm676_vm5 = vweird.f32 %v655_v23 }
 0x5fa   :  { %v659_v30 = vmul.f32 %v1458_v13, %v658_v24  ;;  %1359 = vmatmul.msk.f32.vlgmr.msrb.gmra.mxu0 %vm348_vm15, %v794_v31 }
 0x5fb   :  { %v798_v32 = vmul.f32 %v1460_v15, %v797_v25  ;;  %713 = vmatpush.msra.mxu2 %v1408_v27  ;;  %v683_v55 = vor.u32 1.1754944e-38, %v682_v49  ;;  %vm681_vm7 = vcmp.eq.f32.partialorder %v680_v53, 8.507059e+37  ;;  %v2029_v49 = vld [vmem:[%s2178_s11] ss:$0 sm:$0xff] }
 0x5fc   :  { %v660_v34 = vadd.f32 %v1458_v13, %v659_v30 }
 0x5fd   :  { %v799_v35 = vadd.f32 %v1460_v15, %v798_v32  ;;  %1044 = vmatpush.msrb.mxu2 %v1015_v21  ;;  %v1013_v32 = vld [vmem:[%s2179_s12 + $0x8] sm:$0xff] }
 0x5fe   :  { %v1462_v37 = vpop.eup %1461  ;;  %v664_v40 = vsel %vm663_vm13, %v1458_v13, %v660_v34 }
 0x5ff   :  { %v803_v41 = vsel %vm802_vm14, %v1460_v15, %v799_v35  ;;  %v669_v42 = vsel %vm666_vm2, %v668_v36, %v664_v40  ;;  %v672_v43 = vmul.f32 %v1462_v37, %v655_v23  ;;  %vm677_vm4 = vweird.f32 %v1462_v37 }
 0x600   :  { %v808_v44 = vsel %vm805_vm3, %v807_v38, %v803_v41  ;;  %v670_v29 = vmul.f32 %v1923_v47, %v669_v42  ;;  %vm678_vm6 = vmor %vm676_vm5, %vm677_vm4 }
 0x601   :  { %v673_v12 = vsub.f32 1.0, %v672_v43  ;;  %v809_v46 = vmul.f32 %v1925_v48, %v808_v44 }
 0x602   :  { %1353 = vmatmul.msk.f32.vlgmr.msra.gmra.mxu2 %vm348_vm15, %v670_v29  ;;  %v2024_v29 = vld [vmem:[%s2177_s10] ss:$0 sm:$0xff] }
 0x603   :  { %v674_v50 = vmul.f32 %v1462_v37, %v673_v12  ;;  %1360 = vmatmul.msk.f32.vlgmr.msra.gmra.mxu1 %vm348_vm15, %v809_v46 }
 0x605   :  { %v675_v54 = vadd.f32 %v1462_v37, %v674_v50 }
 0x607   :  { %v679_v56 = vsel %vm678_vm6, %v1462_v37, %v675_v54 }
 0x608   :  { %v684_v57 = vsel %vm681_vm7, %v683_v55, %v679_v56 }
 0x609   :  { %v685_v47 = vmul.f32 %v1931_v51, %v684_v57  ;;  %v592_v58 = vpop.permute.xlu0 %591 }
 0x60a   :  { %v597_v48 = vsel %vm348_vm15, %v1907_v17, %v592_v58  ;;  %v1413_v17 = vld [vmem:[%s2176_s9] ss:$0 sm:$0xff] }
 0x60b   :  { %1354 = vmatmul.msk.f32.gmra.mxu2 %vm348_vm15, %v685_v47  ;;  %1361 = vmatmul.msk.f32.vlgmr.msrb.gmra.mxu1 %vm183_vm1, %v597_v48 }
 0x613   :  { %1362 = vmatmul.msk.f32.gmra.mxu1 %vm183_vm1, %v598_v61 }
 0x677   :  { %v839_v62 = vpop.f32.mrf.mxu0 }
 0x678   :  { %847 = vrot.lane.b32.xlu1 %v839_v62, %s1519_s28 }
 0x680   :  { %v842_v63 = vpop.f32.mrf.mxu1 }
 0x681   :  { %849 = vrot.lane.b32.xlu0 %v842_v63, %s1519_s28 }
 0x685   :  { %v715_v9 = vpop.f32.mrf.mxu2 }
 0x688   :  { %v892_v51 = vpop.f32.mrf.mxu1 }
 0x689   :  { %v893_v1 = vadd.f32 %v1413_v17, %v892_v51 }
 0x68b   :  { %v1975_v2 = vadd.f32 %v893_v1, %v1734_v39 }
 0x68d   :  { %v910_v18 = vsel %vm183_vm1, %v1975_v2, 0.0 }
 0x68e   :  { %911 = vadd.xlane.f32.xlu2 %v910_v18  ;;  %v718_v39 = vpop.f32.mrf.mxu2 }
 0x690   :  { %v895_v4 = vpop.f32.mrf.mxu1 }
 0x691   :  { %v896_v6 = vadd.f32 %v1413_v17, %v895_v4 }
 0x693   :  { %v1980_v0 = vadd.f32 %v896_v6, %v1741_v45 }
 0x695   :  { %v913_v7 = vsel %vm183_vm1, %v1980_v0, 0.0 }
 0x6a2   :  { %914 = vadd.xlane.f32.xlu1 %v913_v7 }
 0x6ea   :  { %v848_v10 = vpop.permute.xlu1 %847 }
 0x6eb   :  { %v853_v13 = vsel %vm348_vm15, %v715_v9, %v848_v10 }
 0x6ec   :  { %1363 = vmatmul.msk.f32.gmra.mxu1 %vm183_vm1, %v853_v13 }
 0x6f3   :  { %v850_v14 = vpop.permute.xlu0 %849 }
 0x6f4   :  { %v854_v15 = vsel %vm348_vm15, %v718_v39, %v850_v14  ;;  %v1104_v14 = vld [vmem:[%s2181_s14 + $0x38] sm:$0xff] }
 0x6f5   :  { %1364 = vmatmul.msk.f32.gmra.mxu1 %vm183_vm1, %v854_v15  ;;  %1129 = vmatpush.msra.mxu3 %v1104_v14 }
 0x701   :  { %v912_v5 = vpop.xlane.xlu2 %911 }
 0x702   :  { %v922_v45 = vmul.f32 %v912_v5, %v1759_v3  ;;  %v1103_v5 = vld [vmem:[%s2181_s14 + $0x30] sm:$0xff] }
 0x703   :  { %1130 = vmatpush.msra.mxu3 %v1103_v5 }
 0x704   :  { %v926_v11 = vsub.f32 %v1975_v2, %v922_v45  ;;  %v1102_v45 = vld [vmem:[%s2181_s14 + $0x28] sm:$0xff] }
 0x705   :  { %1131 = vmatpush.msra.mxu3 %v1102_v45  ;;  %v1417_v45 = vld [vmem:[%s2182_s15] ss:$0 sm:$0xff] }
 0x706   :  { %v930_v19 = vmul.f32 %v926_v11, %v926_v11 }
 0x708   :  { %v934_v20 = vsel %vm183_vm1, %v930_v19, 0.0  ;;  %v1100_v19 = vld [vmem:[%s2181_s14 + $0x18] sm:$0xff] }
 0x709   :  { %935 = vadd.xlane.f32.xlu1 %v934_v20  ;;  %v1099_v20 = vld [vmem:[%s2181_s14 + $0x10] sm:$0xff] }
 0x715   :  { %v915_v22 = vpop.xlane.xlu1 %914 }
 0x716   :  { %v923_v8 = vmul.f32 %v915_v22, %v1759_v3  ;;  %v1098_v22 = vld [vmem:[%s2181_s14 + $0x8] sm:$0xff] }
 0x718   :  { %v1996_v25 = vsub.f32 %v1980_v0, %v923_v8  ;;  %v2080_v8 = vld [vmem:[%s2180_s13] ss:$0 sm:$0xff] }
 0x71a   :  { %v931_v30 = vmul.f32 %v1996_v25, %v1996_v25 }
 0x71c   :  { %v937_v34 = vsel %vm183_vm1, %v931_v30, 0.0 }
 0x769   :  { %v898_v23 = vpop.f32.mrf.mxu1 }
 0x76a   :  { %v899_v24 = vadd.f32 %v1413_v17, %v898_v23  ;;  %v1097_v23 = vld [vmem:[%s2181_s14] sm:$0xff] }
 0x76c   :  { %v1993_v16 = vadd.f32 %v899_v24, %v1748_v52  ;;  %v1014_v52 = vld [vmem:[%s2179_s12 + $0x10] sm:$0xff] }
 0x76d   :  { %1045 = vmatpush.msrb.mxu2 %v1014_v52 }
 0x76e   :  { %v916_v26 = vsel %vm183_vm1, %v1993_v16, 0.0 }
 0x76f   :  { %917 = vadd.xlane.f32.xlu0 %v916_v26  ;;  %1046 = vmatpush.msrb.mxu2 %v1013_v32 }
 0x771   :  { %1047 = vmatpush.msrb.mxu2 %v1012_v33 }
 0x772   :  { %v901_v27 = vpop.f32.mrf.mxu1 }
 0x773   :  { %v902_v28 = vadd.f32 %v1413_v17, %v901_v27 }
 0x775   :  { %v2009_v31 = vadd.f32 %v902_v28, %v1755_v59 }
 0x777   :  { %v919_v35 = vsel %vm183_vm1, %v2009_v31, 0.0  ;;  %938 = vadd.xlane.f32.xlu0 %v937_v34 }
 0x778   :  { %920 = vadd.xlane.f32.xlu2 %v919_v35 }
 0x77c   :  { %v936_v59 = vpop.xlane.xlu1 %935 }
 0x77d   :  { %v946_v36 = vmul.f32 %v936_v59, %v1759_v3 }
 0x77f   :  { %v950_v37 = vadd.f32 1e-06, %v946_v36 }
 0x781   :  { %1463 = vrsqrt.f32 %v950_v37  ;;  %vm960_vm8 = vweird.f32 %v950_v37 }
 0x787   :  { %v1464_v38 = vpop.eup %1463 }
 0x788   :  { %v955_v40 = vmul.f32 %v1464_v38, %v950_v37  ;;  %vm961_vm15 = vweird.f32 %v1464_v38 }
 0x789   :  { %vm962_vm9 = vmor %vm960_vm8, %vm961_vm15 }
 0x78a   :  { %v956_v41 = vmul.f32 %v1464_v38, %v955_v40 }
 0x78c   :  { %v957_v42 = vmul.f32 0.5, %v956_v41 }
 0x78e   :  { %v958_v43 = vsub.f32 1.5, %v957_v42 }
 0x790   :  { %v959_v44 = vmul.f32 %v1464_v38, %v958_v43 }
 0x792   :  { %v963_v12 = vsel %vm962_vm9, %v1464_v38, %v959_v44 }
 0x793   :  { %v994_v46 = vmul.f32 %v963_v12, %v926_v11  ;;  %v1101_v11 = vld [vmem:[%s2181_s14 + $0x20] sm:$0xff] }
 0x794   :  { %1132 = vmatpush.msra.mxu3 %v1101_v11 }
 0x795   :  { %v1001_v50 = vmul.f32 %v2024_v29, %v994_v46 }
 0x796   :  { %1133 = vmatpush.msra.mxu3 %v1100_v19 }
 0x797   :  { %v1008_v53 = vadd.f32 %v2029_v49, %v1001_v50 }
 0x798   :  { %1134 = vmatpush.msra.mxu3 %v1099_v20 }
 0x799   :  { %1365 = vmatmul.msk.f32.vlgmr.msrb.gmra.mxu2 %vm183_vm1, %v1008_v53 }
 0x79a   :  { %1135 = vmatpush.msra.mxu3 %v1098_v22 }
 0x79c   :  { %1136 = vmatpush.msra.mxu3 %v1097_v23 }
 0x7e2   :  { %v918_v54 = vpop.xlane.xlu0 %917 }
 0x7e3   :  { %v924_v55 = vmul.f32 %v918_v54, %v1759_v3 }
 0x7e5   :  { %v2036_v56 = vsub.f32 %v1993_v16, %v924_v55 }
 0x7e7   :  { %v932_v57 = vmul.f32 %v2036_v56, %v2036_v56 }
 0x7e9   :  { %v940_v47 = vsel %vm183_vm1, %v932_v57, 0.0 }
 0x7ea   :  { %v939_v58 = vpop.xlane.xlu0 %938  ;;  %941 = vadd.xlane.f32.xlu2 %v940_v47 }
 0x7eb   :  { %v921_v48 = vpop.xlane.xlu2 %920  ;;  %v947_v60 = vmul.f32 %v939_v58, %v1759_v3 }
 0x7ec   :  { %v925_v61 = vmul.f32 %v921_v48, %v1759_v3 }
 0x7ed   :  { %v951_v62 = vadd.f32 1e-06, %v947_v60 }
 0x7ee   :  { %v2044_v63 = vsub.f32 %v2009_v31, %v925_v61 }
 0x7ef   :  { %1465 = vrsqrt.f32 %v951_v62  ;;  %vm970_vm11 = vweird.f32 %v951_v62 }
 0x7f0   :  { %v933_v17 = vmul.f32 %v2044_v63, %v2044_v63 }
 0x7f2   :  { %v943_v51 = vsel %vm183_vm1, %v933_v17, 0.0 }
 0x7f3   :  { %944 = vadd.xlane.f32.xlu1 %v943_v51 }
 0x7f5   :  { %v1466_v1 = vpop.eup %1465 }
 0x7f6   :  { %v965_v18 = vmul.f32 %v1466_v1, %v951_v62  ;;  %vm971_vm10 = vweird.f32 %v1466_v1 }
 0x7f7   :  { %vm972_vm12 = vmor %vm970_vm11, %vm971_vm10 }
 0x7f8   :  { %v966_v4 = vmul.f32 %v1466_v1, %v965_v18 }
 0x7fa   :  { %v967_v6 = vmul.f32 0.5, %v966_v4 }
 0x7fc   :  { %v968_v7 = vsub.f32 1.5, %v967_v6 }
 0x7fe   :  { %v969_v9 = vmul.f32 %v1466_v1, %v968_v7 }
 0x800   :  { %v973_v10 = vsel %vm972_vm12, %v1466_v1, %v969_v9 }
 0x801   :  { %v995_v13 = vmul.f32 %v973_v10, %v1996_v25 }
 0x803   :  { %v1002_v39 = vmul.f32 %v2024_v29, %v995_v13 }
 0x805   :  { %v1009_v15 = vadd.f32 %v2029_v49, %v1002_v39 }
 0x807   :  { %1366 = vmatmul.msk.f32.gmra.mxu2 %vm183_vm1, %v1009_v15 }
 0x81c   :  { %v1049_v24 = vpop.f32.mrf.mxu2 }
 0x81d   :  { %v1050_v25 = vadd.f32 %v2080_v8, %v1049_v24 }
 0x81f   :  { %v1065_v26 = vmul.f32 0.044715, %v1050_v25  ;;  %v1061_v32 = vmul.f32 0.5, %v1050_v25 }
 0x821   :  { %v1069_v27 = vmul.f32 %v1065_v26, %v1050_v25 }
 0x823   :  { %v1073_v21 = vmul.f32 %v1069_v27, %v1050_v25 }
 0x825   :  { %v1077_v28 = vadd.f32 %v1073_v21, %v1050_v25 }
 0x827   :  { %v1081_v30 = vmul.f32 0.7978846, %v1077_v28 }
 0x829   :  { %1467 = vtanh.f32 %v1081_v30 }
 0x82f   :  { %v1468_v52 = vpop.eup %1467 }
 0x830   :  { %v1089_v33 = vadd.f32 1.0, %v1468_v52 }
 0x832   :  { %v1093_v34 = vmul.f32 %v1089_v33, %v1061_v32 }
 0x834   :  { %1369 = vmatmul.msk.f32.vlgmr.msra.gmra.mxu3 %vm102_vm0, %v1093_v34 }
 0x85d   :  { %v942_v35 = vpop.xlane.xlu2 %941 }
 0x85e   :  { %v948_v59 = vmul.f32 %v942_v35, %v1759_v3 }
 0x860   :  { %v952_v36 = vadd.f32 1e-06, %v948_v59 }
 0x862   :  { %1469 = vrsqrt.f32 %v952_v36  ;;  %vm980_vm14 = vweird.f32 %v952_v36 }
 0x866   :  { %v945_v37 = vpop.xlane.xlu1 %944 }
 0x867   :  { %v949_v38 = vmul.f32 %v945_v37, %v1759_v3 }
 0x868   :  { %v1470_v40 = vpop.eup %1469 }
 0x869   :  { %v953_v41 = vadd.f32 1e-06, %v949_v38  ;;  %v975_v42 = vmul.f32 %v1470_v40, %v952_v36  ;;  %vm981_vm13 = vweird.f32 %v1470_v40 }
 0x86a   :  { %vm982_vm2 = vmor %vm980_vm14, %vm981_vm13 }
 0x86b   :  { %1471 = vrsqrt.f32 %v953_v41  ;;  %v976_v43 = vmul.f32 %v1470_v40, %v975_v42  ;;  %vm990_vm4 = vweird.f32 %v953_v41 }
 0x86d   :  { %v977_v44 = vmul.f32 0.5, %v976_v43 }
 0x86f   :  { %v978_v12 = vsub.f32 1.5, %v977_v44 }
 0x871   :  { %v1472_v46 = vpop.eup %1471  ;;  %v979_v50 = vmul.f32 %v1470_v40, %v978_v12  ;;  %v1418_v12 = vld [vmem:[%s2184_s17] ss:$0 sm:$0xff] }
 0x872   :  { %v985_v53 = vmul.f32 %v1472_v46, %v953_v41  ;;  %vm991_vm3 = vweird.f32 %v1472_v46 }
 0x873   :  { %v983_v54 = vsel %vm982_vm2, %v1470_v40, %v979_v50  ;;  %vm992_vm5 = vmor %vm990_vm4, %vm991_vm3 }
 0x874   :  { %v986_v55 = vmul.f32 %v1472_v46, %v985_v53  ;;  %v996_v57 = vmul.f32 %v983_v54, %v2036_v56  ;;  %v1157_v56 = vld [vmem:[%s2183_s16 + $0x18] sm:$0xff] }
 0x875   :  { %1186 = vmatpush.msra.mxu0 %v1157_v56 }
 0x876   :  { %v987_v47 = vmul.f32 0.5, %v986_v55  ;;  %v1003_v58 = vmul.f32 %v2024_v29, %v996_v57 }
 0x878   :  { %v988_v48 = vsub.f32 1.5, %v987_v47  ;;  %v1010_v60 = vadd.f32 %v2029_v49, %v1003_v58 }
 0x87a   :  { %v989_v61 = vmul.f32 %v1472_v46, %v988_v48  ;;  %1367 = vmatmul.msk.f32.gmra.mxu2 %vm183_vm1, %v1010_v60 }
 0x87c   :  { %v993_v62 = vsel %vm992_vm5, %v1472_v46, %v989_v61 }
 0x87d   :  { %v997_v17 = vmul.f32 %v993_v62, %v2044_v63  ;;  %v1154_v63 = vld [vmem:[%s2183_s16] sm:$0xff] }
 0x87f   :  { %v1004_v51 = vmul.f32 %v2024_v29, %v997_v17  ;;  %v1156_v29 = vld [vmem:[%s2183_s16 + $0x10] sm:$0xff] }
 0x880   :  { %1187 = vmatpush.msra.mxu0 %v1156_v29 }
 0x881   :  { %v1011_v1 = vadd.f32 %v2029_v49, %v1004_v51  ;;  %v1155_v49 = vld [vmem:[%s2183_s16 + $0x8] sm:$0xff] }
 0x882   :  { %1188 = vmatpush.msra.mxu0 %v1155_v49 }
 0x883   :  { %1368 = vmatmul.msk.f32.gmra.mxu2 %vm183_vm1, %v1011_v1 }
 0x884   :  { %1189 = vmatpush.msra.mxu0 %v1154_v63 }
 0x88a   :  { %v1052_v18 = vpop.f32.mrf.mxu2 }
 0x88b   :  { %v1053_v4 = vadd.f32 %v2080_v8, %v1052_v18 }
 0x88d   :  { %v1066_v6 = vmul.f32 0.044715, %v1053_v4  ;;  %v1062_v14 = vmul.f32 0.5, %v1053_v4 }
 0x88f   :  { %v1070_v7 = vmul.f32 %v1066_v6, %v1053_v4 }
 0x891   :  { %v1074_v9 = vmul.f32 %v1070_v7, %v1053_v4 }
 0x893   :  { %v1078_v10 = vadd.f32 %v1074_v9, %v1053_v4 }
 0x895   :  { %v1082_v13 = vmul.f32 0.7978846, %v1078_v10 }
 0x897   :  { %1473 = vtanh.f32 %v1082_v13 }
 0x89d   :  { %v1474_v39 = vpop.eup %1473 }
 0x89e   :  { %v1090_v15 = vadd.f32 1.0, %v1474_v39 }
 0x8a0   :  { %v1094_v5 = vmul.f32 %v1090_v15, %v1062_v14 }
 0x8a2   :  { %1370 = vmatmul.msk.f32.gmra.mxu3 %vm102_vm0, %v1094_v5 }
 0x8b7   :  { %v1138_v11 = vpop.f32.mrf.mxu3 }
 0x8b8   :  { %v1139_v19 = vadd.f32 %v1417_v45, %v1138_v11 }
 0x8ba   :  { %v1150_v20 = vadd.f32 %v1139_v19, %v1975_v2 }
 0x8bc   :  { %1373 = vmatmul.msk.f32.vlgmr.msra.gmra.mxu0 %vm183_vm1, %v1150_v20 }
 0x8fd   :  { %v1055_v22 = vpop.f32.mrf.mxu2 }
 0x8fe   :  { %v1056_v23 = vadd.f32 %v2080_v8, %v1055_v22  ;;  %v2138_v22 = vld [vmem:[%s2185_s18] ss:$0 sm:$0xff]  ;;  %s1520_s18 = smov [#allocation2]  }
 0x900   :  { %v1067_v24 = vmul.f32 0.044715, %v1056_v23  ;;  %v1063_v59 = vmul.f32 0.5, %v1056_v23 }
 0x902   :  { %v1071_v25 = vmul.f32 %v1067_v24, %v1056_v23  ;;  %v2143_v24 = vld [vmem:[%s2186_s19] ss:$0 sm:$0xff]  ;;  %s1315_s19 = sshll.u32 %s1520_s18, 4  ;;  %s1316_s19 = int_to_ptr.vmem [resolvable:$true] %s1315_s19 }
 0x904   :  { %v1075_v26 = vmul.f32 %v1071_v25, %v1056_v23 }
 0x906   :  { %v1058_v27 = vpop.f32.mrf.mxu2  ;;  %v1079_v28 = vadd.f32 %v1075_v26, %v1056_v23 }
 0x907   :  { %v1059_v21 = vadd.f32 %v2080_v8, %v1058_v27 }
 0x908   :  { %v1083_v52 = vmul.f32 0.7978846, %v1079_v28 }
 0x909   :  { %v1068_v30 = vmul.f32 0.044715, %v1059_v21  ;;  %v1064_v40 = vmul.f32 0.5, %v1059_v21 }
 0x90a   :  { %1475 = vtanh.f32 %v1083_v52 }
 0x90b   :  { %v1072_v32 = vmul.f32 %v1068_v30, %v1059_v21 }
 0x90d   :  { %v1076_v33 = vmul.f32 %v1072_v32, %v1059_v21 }
 0x90f   :  { %v1080_v34 = vadd.f32 %v1076_v33, %v1059_v21 }
 0x910   :  { %v1476_v35 = vpop.eup %1475 }
 0x911   :  { %v1084_v2 = vmul.f32 0.7978846, %v1080_v34  ;;  %v1091_v36 = vadd.f32 1.0, %v1476_v35 }
 0x913   :  { %1477 = vtanh.f32 %v1084_v2  ;;  %v1095_v37 = vmul.f32 %v1091_v36, %v1063_v59 }
 0x915   :  { %1371 = vmatmul.msk.f32.gmra.mxu3 %vm102_vm0, %v1095_v37 }
 0x919   :  { %v1478_v38 = vpop.eup %1477 }
 0x91a   :  { %v1092_v41 = vadd.f32 1.0, %v1478_v38 }
 0x91c   :  { %v1096_v42 = vmul.f32 %v1092_v41, %v1064_v40 }
 0x91e   :  { %1372 = vmatmul.msk.f32.gmra.mxu3 %vm102_vm0, %v1096_v42 }
 0x925   :  { %v1141_v8 = vpop.f32.mrf.mxu3 }
 0x926   :  { %v1142_v43 = vadd.f32 %v1417_v45, %v1141_v8 }
 0x928   :  { %v1151_v44 = vadd.f32 %v1142_v43, %v1980_v0 }
 0x92a   :  { %1374 = vmatmul.msk.f32.gmra.mxu0 %vm183_vm1, %v1151_v44 }
 0x939   :  { %v1191_v46 = vpop.f32.mrf.mxu0 }
 0x93a   :  { %v1192_v50 = vadd.f32 %v1418_v12, %v1191_v46 }
 0x93c   :  { %v1205_v53 = vsel %vm183_vm1, %v1192_v50, 0.0 }
 0x93d   :  { %1206 = vadd.xlane.f32.xlu0 %v1205_v53 }
 0x998   :  { %v1144_v54 = vpop.f32.mrf.mxu3 }
 0x999   :  { %v1145_v55 = vadd.f32 %v1417_v45, %v1144_v54 }
 0x99b   :  { %v1152_v57 = vadd.f32 %v1145_v55, %v1993_v16 }
 0x99d   :  { %1375 = vmatmul.msk.f32.gmra.mxu0 %vm183_vm1, %v1152_v57 }
 0x9a1   :  { %v1147_v47 = vpop.f32.mrf.mxu3 }
 0x9a2   :  { %v1148_v58 = vadd.f32 %v1417_v45, %v1147_v47 }
 0x9a4   :  { %v1153_v0 = vadd.f32 %v1148_v58, %v2009_v31 }
 0x9a6   :  { %1376 = vmatmul.msk.f32.gmra.mxu0 %vm183_vm1, %v1153_v0 }
 0x9a7   :  { %v1194_v48 = vpop.f32.mrf.mxu0 }
 0x9a8   :  { %v1195_v60 = vadd.f32 %v1418_v12, %v1194_v48 }
 0x9aa   :  { %v1208_v61 = vsel %vm183_vm1, %v1195_v60, 0.0 }
 0x9ab   :  { %1209 = vadd.xlane.f32.xlu2 %v1208_v61 }
 0x9b0   :  { %v1207_v62 = vpop.xlane.xlu0 %1206 }
 0x9b1   :  { %v1217_v17 = vmul.f32 %v1207_v62, %v1759_v3 }
 0x9b3   :  { %v1221_v51 = vsub.f32 %v1192_v50, %v1217_v17 }
 0x9b5   :  { %v1225_v1 = vmul.f32 %v1221_v51, %v1221_v51 }
 0x9b7   :  { %v1229_v16 = vsel %vm183_vm1, %v1225_v1, 0.0 }
 0x9b8   :  { %1230 = vadd.xlane.f32.xlu2 %v1229_v16 }
 0xa1a   :  { %v1197_v56 = vpop.f32.mrf.mxu0 }
 0xa1b   :  { %v1198_v18 = vadd.f32 %v1418_v12, %v1197_v56 }
 0xa1d   :  { %v1211_v4 = vsel %vm183_vm1, %v1198_v18, 0.0 }
 0xa1e   :  { %1212 = vadd.xlane.f32.xlu1 %v1211_v4  ;;  %v1210_v31 = vpop.xlane.xlu2 %1209 }
 0xa1f   :  { %v1218_v6 = vmul.f32 %v1210_v31, %v1759_v3 }
 0xa21   :  { %v1222_v7 = vsub.f32 %v1195_v60, %v1218_v6 }
 0xa23   :  { %v1200_v9 = vpop.f32.mrf.mxu0  ;;  %v1226_v13 = vmul.f32 %v1222_v7, %v1222_v7 }
 0xa24   :  { %v1201_v10 = vadd.f32 %v1418_v12, %v1200_v9 }
 0xa25   :  { %v1232_v49 = vsel %vm183_vm1, %v1226_v13, 0.0 }
 0xa26   :  { %v1214_v29 = vsel %vm183_vm1, %v1201_v10, 0.0  ;;  %1233 = vadd.xlane.f32.xlu1 %v1232_v49 }
 0xa27   :  { %1215 = vadd.xlane.f32.xlu0 %v1214_v29 }
 0xa2b   :  { %v1231_v63 = vpop.xlane.xlu2 %1230 }
 0xa2c   :  { %v1241_v39 = vmul.f32 %v1231_v63, %v1759_v3 }
 0xa2e   :  { %v1245_v14 = vadd.f32 1e-06, %v1241_v39 }
 0xa30   :  { %1479 = vrsqrt.f32 %v1245_v14  ;;  %vm1255_vm6 = vweird.f32 %v1245_v14 }
 0xa36   :  { %v1480_v15 = vpop.eup %1479 }
 0xa37   :  { %v1250_v5 = vmul.f32 %v1480_v15, %v1245_v14  ;;  %vm1256_vm0 = vweird.f32 %v1480_v15 }
 0xa38   :  { %vm1257_vm7 = vmor %vm1255_vm6, %vm1256_vm0 }
 0xa39   :  { %v1251_v45 = vmul.f32 %v1480_v15, %v1250_v5 }
 0xa3b   :  { %v1252_v11 = vmul.f32 0.5, %v1251_v45 }
 0xa3d   :  { %v1253_v19 = vsub.f32 1.5, %v1252_v11 }
 0xa3f   :  { %v1254_v20 = vmul.f32 %v1480_v15, %v1253_v19 }
 0xa41   :  { %v1258_v23 = vsel %vm1257_vm7, %v1480_v15, %v1254_v20 }
 0xa42   :  { %v1289_v25 = vmul.f32 %v1258_v23, %v1221_v51 }
 0xa44   :  { %v1296_v26 = vmul.f32 %v2138_v22, %v1289_v25 }
 0xa46   :  { %v1303_v27 = vadd.f32 %v2143_v24, %v1296_v26 }
 0xa48   :  { %1307 = vst.msk [vmem:[#allocation2] sm:$0xff] %vm183_vm1, %v1303_v27 }
 0xa91   :  { %v1213_v21 = vpop.xlane.xlu1 %1212 }
 0xa92   :  { %v1219_v28 = vmul.f32 %v1213_v21, %v1759_v3 }
 0xa94   :  { %v1223_v30 = vsub.f32 %v1198_v18, %v1219_v28 }
 0xa96   :  { %v1227_v52 = vmul.f32 %v1223_v30, %v1223_v30 }
 0xa98   :  { %v1235_v32 = vsel %vm183_vm1, %v1227_v52, 0.0 }
 0xa99   :  { %1236 = vadd.xlane.f32.xlu0 %v1235_v32  ;;  %v1234_v34 = vpop.xlane.xlu1 %1233 }
 0xa9a   :  { %v1216_v33 = vpop.xlane.xlu0 %1215  ;;  %v1242_v2 = vmul.f32 %v1234_v34, %v1759_v3 }
 0xa9b   :  { %v1220_v35 = vmul.f32 %v1216_v33, %v1759_v3 }
 0xa9c   :  { %v1246_v36 = vadd.f32 1e-06, %v1242_v2 }
 0xa9d   :  { %v1224_v59 = vsub.f32 %v1201_v10, %v1220_v35 }
 0xa9e   :  { %1481 = vrsqrt.f32 %v1246_v36  ;;  %vm1265_vm8 = vweird.f32 %v1246_v36 }
 0xa9f   :  { %v1228_v37 = vmul.f32 %v1224_v59, %v1224_v59 }
 0xaa1   :  { %v1238_v38 = vsel %vm183_vm1, %v1228_v37, 0.0 }
 0xaa2   :  { %1239 = vadd.xlane.f32.xlu2 %v1238_v38 }
 0xaa4   :  { %v1482_v40 = vpop.eup %1481 }
 0xaa5   :  { %v1260_v41 = vmul.f32 %v1482_v40, %v1246_v36  ;;  %vm1266_vm15 = vweird.f32 %v1482_v40 }
 0xaa6   :  { %vm1267_vm9 = vmor %vm1265_vm8, %vm1266_vm15 }
 0xaa7   :  { %v1261_v42 = vmul.f32 %v1482_v40, %v1260_v41 }
 0xaa9   :  { %v1262_v8 = vmul.f32 0.5, %v1261_v42 }
 0xaab   :  { %v1263_v43 = vsub.f32 1.5, %v1262_v8 }
 0xaad   :  { %v1264_v44 = vmul.f32 %v1482_v40, %v1263_v43 }
 0xaaf   :  { %v1268_v12 = vsel %vm1267_vm9, %v1482_v40, %v1264_v44 }
 0xab0   :  { %v1290_v46 = vmul.f32 %v1268_v12, %v1222_v7 }
 0xab2   :  { %v1297_v50 = vmul.f32 %v2138_v22, %v1290_v46 }
 0xab4   :  { %v1304_v53 = vadd.f32 %v2143_v24, %v1297_v50 }
 0xab6   :  { %1308 = vst.msk [vmem:[#allocation2 + $0x8] sm:$0xff] %vm183_vm1, %v1304_v53 }
 0xb0c   :  { %v1237_v54 = vpop.xlane.xlu0 %1236 }
 0xb0d   :  { %v1243_v55 = vmul.f32 %v1237_v54, %v1759_v3 }
 0xb0f   :  { %v1247_v57 = vadd.f32 1e-06, %v1243_v55 }
 0xb11   :  { %1483 = vrsqrt.f32 %v1247_v57  ;;  %vm1275_vm11 = vweird.f32 %v1247_v57 }
 0xb15   :  { %v1240_v47 = vpop.xlane.xlu2 %1239 }
 0xb16   :  { %v1244_v58 = vmul.f32 %v1240_v47, %v1759_v3 }
 0xb17   :  { %v1484_v0 = vpop.eup %1483 }
 0xb18   :  { %v1248_v48 = vadd.f32 1e-06, %v1244_v58  ;;  %v1270_v60 = vmul.f32 %v1484_v0, %v1247_v57  ;;  %vm1276_vm10 = vweird.f32 %v1484_v0 }
 0xb19   :  { %vm1277_vm12 = vmor %vm1275_vm11, %vm1276_vm10 }
 0xb1a   :  { %1485 = vrsqrt.f32 %v1248_v48  ;;  %v1271_v61 = vmul.f32 %v1484_v0, %v1270_v60  ;;  %vm1285_vm14 = vweird.f32 %v1248_v48 }
 0xb1c   :  { %v1272_v62 = vmul.f32 0.5, %v1271_v61 }
 0xb1e   :  { %v1273_v17 = vsub.f32 1.5, %v1272_v62 }
 0xb20   :  { %v1486_v51 = vpop.eup %1485  ;;  %v1274_v1 = vmul.f32 %v1484_v0, %v1273_v17 }
 0xb21   :  { %v1280_v16 = vmul.f32 %v1486_v51, %v1248_v48  ;;  %vm1286_vm13 = vweird.f32 %v1486_v51 }
 0xb22   :  { %v1278_v56 = vsel %vm1277_vm12, %v1484_v0, %v1274_v1  ;;  %vm1287_vm2 = vmor %vm1285_vm14, %vm1286_vm13 }
 0xb23   :  { %v1281_v18 = vmul.f32 %v1486_v51, %v1280_v16  ;;  %v1291_v4 = vmul.f32 %v1278_v56, %v1223_v30 }
 0xb25   :  { %v1282_v31 = vmul.f32 0.5, %v1281_v18  ;;  %v1298_v6 = vmul.f32 %v2138_v22, %v1291_v4 }
 0xb27   :  { %v1283_v3 = vsub.f32 1.5, %v1282_v31  ;;  %v1305_v7 = vadd.f32 %v2143_v24, %v1298_v6 }
 0xb29   :  { %v1284_v9 = vmul.f32 %v1486_v51, %v1283_v3  ;;  %1309 = vst.msk [vmem:[#allocation2 + $0x10] sm:$0xff] %vm183_vm1, %v1305_v7 }
 0xb2b   :  { %v1288_v10 = vsel %vm1287_vm2, %v1486_v51, %v1284_v9 }
 0xb2c   :  { %v1292_v13 = vmul.f32 %v1288_v10, %v1224_v59 }
 0xb2e   :  { %v1299_v29 = vmul.f32 %v2138_v22, %v1292_v13 }
 0xb30   :  { %v1306_v49 = vadd.f32 %v2143_v24, %v1299_v29 }
 0xb32   :  { %1310 = vst.msk [vmem:[#allocation2 + $0x18] sm:$0xff] %vm183_vm1, %v1306_v49 }
 0xb33   :  { %1323 = dma.vmem_to_hbm [thread:$0]  %s1316_s19, 512, %s1318_s29, [#allocation3], %s1521_s8, %s1521_s8, %s1522_s24  }
 0xb34   :  { %1511 = dma.done.wait [#allocation3], 512  }
 0xb35   :  { %1512 = vsyncadd [#allocation3], 4294966784 }
 0xb36   :  { %1328 = vsyncpa [#allocation3], 1 }

</bundles_post_ra>
